<compile_context>
chip_gen: v7x
topology: tpu7x:2x2x1
jax: 0.10.0
libtpu: 0.0.40
codegen_flags: <defaults>
</compile_context>

<pallas_src>
import functools

import numpy as np
import jax
import jax.numpy as jnp
from jax import lax
from jax.experimental import pallas as pl
from jax.experimental.pallas import tpu as pltpu


def lstm_kernel(tok_ref, emb_wih_ref, whh_ref, b_ref, who_ref, bho_ref,
                scores_ref, gx_ref, hs_ref, *, T, BBLK):
    """One batch block (BBLK sequences): fused gather+projection, unrolled recurrence,
    head matmul + log_softmax.

    Padded-lane invariant: padded lanes of each gate have zero weights and zero bias,
    so i/f/o pads = sigmoid(0) = 0.5 and g pad = 0, which keeps the padded lanes of
    c and h exactly zero for the whole recurrence (zeros are exact in bf16 too).
    """
    HP = whh_ref.shape[0]
    NV = emb_wih_ref.shape[0]
    TB = T * BBLK

    # Fused embedding gather + input projection for all timesteps of the block:
    # emb_wih[v] = emb[v] @ wih^T was precomputed once, so this one-hot MXU matmul
    # both gathers and projects: gx[row] = emb_wih[token[row]] + bias.   (TB, 4*HP)
    tok = tok_ref[...]                                              # (TB, 1) int32
    col = lax.broadcasted_iota(jnp.int32, (TB, NV), 1)
    onehot = (col == tok).astype(jnp.bfloat16)
    gx_ref[...] = (
        jnp.dot(onehot, emb_wih_ref[...], preferred_element_type=jnp.float32)
        + b_ref[...]
    )

    h = jnp.zeros((BBLK, HP), jnp.float32)
    c = jnp.zeros((BBLK, HP), jnp.float32)

    # T is static -> fully unrolled serial recurrence; all slices static and lane
    # aligned; whh streams from VMEM into the MXU each step.
    # TODO(synk): keeping whh resident in the MXU across steps
    # (pltpu.matmul_push_rhs / matmul_acc_lhs / matmul_pop) would shorten the serial
    # per-step path further, but is generation-specific; jnp.dot kept for portability.
    for t in range(T):
        gates = gx_ref[t * BBLK:(t + 1) * BBLK, :] + jnp.dot(
            h.astype(jnp.bfloat16), whh_ref[...],
            preferred_element_type=jnp.float32)
        sig = jax.nn.sigmoid(gates[:, 0:3 * HP])        # i, f, o in one EUP pass
        g_g = jnp.tanh(gates[:, 3 * HP:4 * HP])         # g in one EUP pass
        i_g = sig[:, 0:HP]
        f_g = sig[:, HP:2 * HP]
        o_g = sig[:, 2 * HP:3 * HP]
        c = f_g * c + i_g * g_g
        h = o_g * jnp.tanh(c)
        hs_ref[t * BBLK:(t + 1) * BBLK, :] = h

    # final_output = h2o(tanh(output))   (dropout is identity at inference)
    logits = (
        jnp.dot(jnp.tanh(hs_ref[...]).astype(jnp.bfloat16), who_ref[...],
                preferred_element_type=jnp.float32)
        + bho_ref[...]
    )
    # log_softmax over classes; padded classes carry -1e30 bias -> never contribute.
    m = jnp.max(logits, axis=-1, keepdims=True)
    shifted = logits - m
    lse = jnp.log(jnp.sum(jnp.exp(shifted), axis=-1, keepdims=True))
    scores_ref[...] = shifted - lse                     # lane-dense (TB, VP) store


def _round_up(x, m):
    return ((x + m - 1) // m) * m


def prepare_params(emb, w_ih, w_hh, b_ih, b_hh, w_ho, b_ho):
    """One-time repacking (call once, reuse across forward calls).

    Reorders gates i,f,g,o -> i,f,o,g, pads H->HP=128 and V->VP=128, transposes,
    folds the embedding table through the input projection, casts MXU operands bf16.
    """
    H = w_hh.shape[1]
    V = w_ho.shape[0]
    HP = _round_up(H, 128)
    VP = _round_up(V, 128)

    def regroup_pad(w):
        # (4H, ...) in PyTorch gate order i,f,g,o -> (4*HP, ...) in i,f,o,g order,
        # each gate block zero padded from H to HP rows.
        i, f, g, o = w[0:H], w[H:2 * H], w[2 * H:3 * H], w[3 * H:4 * H]
        pad = [(0, HP - H)] + [(0, 0)] * (w.ndim - 1)
        return jnp.concatenate([jnp.pad(blk, pad) for blk in (i, f, o, g)], axis=0)

    wih_t = regroup_pad(w_ih).astype(jnp.float32).T                    # (E, 4*HP)
    # Fold embedding gather into the input projection: emb_wih[v] = emb[v] @ wih^T.
    emb_wih = (emb.astype(jnp.float32) @ wih_t).astype(jnp.bfloat16)   # (NV, 4*HP)
    whh_t = jnp.pad(regroup_pad(w_hh),
                    ((0, 0), (0, HP - H))).T.astype(jnp.bfloat16)      # (HP, 4*HP)
    bias = regroup_pad(b_ih + b_hh)[None, :].astype(jnp.float32)       # (1, 4*HP)
    who_t = jnp.pad(w_ho, ((0, VP - V), (0, HP - H))).T.astype(jnp.bfloat16)
    # Padded class columns get a hugely negative bias -> never win max / add to LSE.
    bho = jnp.pad(b_ho, (0, VP - V),
                  constant_values=-1e30)[None, :].astype(jnp.float32)  # (1, VP)
    return dict(emb_wih=emb_wih, whh_t=whh_t, bias=bias, who_t=who_t, bho=bho)


@functools.partial(jax.jit, static_argnames=("num_labels", "block_b"))
def lstm_forward(tokens, emb_wih, whh_t, bias, who_t, bho, *, num_labels, block_b=8):
    """Batched forward: tokens (B, T) int32 -> (B, T, num_labels) log-softmax scores.

    Each row is an independent sequence with a fresh zero hidden state, i.e. one call
    of the PyTorch module's forward per row (single-sequence use = B=1, padded to 8).
    """
    # TODO(synk): nn.Dropout is stochastic; modeled as identity (eval-mode semantics).
    # TODO(synk): the nn.Module carries self.hidden across calls; here every sequence
    #             starts from zero hidden/cell state (init_hidden semantics).
    B, T = tokens.shape
    HP = whh_t.shape[0]
    VP = bho.shape[1]
    nb = -(-B // block_b)
    Bp = nb * block_b
    TB = T * block_b

    # Row layout per batch block: row = t * block_b + b_local (contiguous per step).
    tok_p = jnp.pad(tokens.astype(jnp.int32), ((0, Bp - B), (0, 0)))
    tok_tb = (tok_p.reshape(nb, block_b, T)
                    .transpose(0, 2, 1)
                    .reshape(nb * TB, 1))

    kernel = functools.partial(lstm_kernel, T=T, BBLK=block_b)
    scores = pl.pallas_call(
        kernel,
        out_shape=jax.ShapeDtypeStruct((nb * TB, VP), jnp.float32),
        grid=(nb,),
        in_specs=[
            pl.BlockSpec((TB, 1), lambda i: (i, 0)),          # tokens of this block
            pl.BlockSpec(emb_wih.shape, lambda i: (0, 0)),    # weights stay resident
            pl.BlockSpec(whh_t.shape, lambda i: (0, 0)),
            pl.BlockSpec(bias.shape, lambda i: (0, 0)),
            pl.BlockSpec(who_t.shape, lambda i: (0, 0)),
            pl.BlockSpec(bho.shape, lambda i: (0, 0)),
        ],
        out_specs=pl.BlockSpec((TB, VP), lambda i: (i, 0)),
        scratch_shapes=[
            pltpu.VMEM((TB, 4 * HP), jnp.float32),   # gx: fused gather + projection
            pltpu.VMEM((TB, HP), jnp.float32),       # per-step hidden outputs
        ],
        compiler_params=pltpu.CompilerParams(
            dimension_semantics=("parallel",)),       # v7x: 2 TCs split batch blocks
    )(tok_tb, emb_wih, whh_t, bias, who_t, bho)

    scores = (scores.reshape(nb, T, block_b, VP)
                     .transpose(0, 2, 1, 3)
                     .reshape(Bp, T, VP))
    return scores[:B, :, :num_labels]


def reference_forward(tokens, emb, w_ih, w_hh, b_ih, b_hh, w_ho, b_ho):
    """Pure-JAX f32 reference mirroring the PyTorch forward (eval-mode dropout)."""
    embeds = jnp.take(emb, tokens, axis=0)
    H = w_hh.shape[1]

    def step(carry, x_t):
        h, c = carry
        g = x_t @ w_ih.T + h @ w_hh.T + b_ih + b_hh
        i = jax.nn.sigmoid(g[0:H])
        f = jax.nn.sigmoid(g[H:2 * H])
        gg = jnp.tanh(g[2 * H:3 * H])
        o = jax.nn.sigmoid(g[3 * H:4 * H])
        c = f * c + i * gg
        h = o * jnp.tanh(c)
        return (h, c), h

    h0 = jnp.zeros((H,), jnp.float32)
    c0 = jnp.zeros((H,), jnp.float32)
    _, outs = lax.scan(step, (h0, c0), embeds)
    logits = jnp.tanh(outs) @ w_ho.T + b_ho
    return jax.nn.log_softmax(logits, axis=-1)


if __name__ == "__main__":
    # Module-consistent small shapes: seq len T, embedding E, hidden H, vocab /
    # num_labels V (num_labels = vocab_size in the module).  B=16 independent
    # sequences (2 grid steps of 8) per the performance review's batching advice.
    B, T, E, H, V = 16, 8, 16, 32, 64

    key = jax.random.PRNGKey(0)
    keys = jax.random.split(key, 8)
    scale = 1.0 / np.sqrt(H)

    emb = jax.random.normal(keys[0], (V, E), jnp.float32) * 0.1
    w_ih = jax.random.uniform(keys[1], (4 * H, E), jnp.float32, -scale, scale)
    w_hh = jax.random.uniform(keys[2], (4 * H, H), jnp.float32, -scale, scale)
    b_ih = jax.random.uniform(keys[3], (4 * H,), jnp.float32, -scale, scale)
    b_hh = jax.random.uniform(keys[4], (4 * H,), jnp.float32, -scale, scale)
    w_ho = jax.random.uniform(keys[5], (V, H), jnp.float32, -scale, scale)
    b_ho = jax.random.uniform(keys[6], (V,), jnp.float32, -scale, scale)
    tokens = jax.random.randint(keys[7], (B, T), 0, V, jnp.int32)

    # One-time weight repacking (cached across forward calls).
    params = prepare_params(emb, w_ih, w_hh, b_ih, b_hh, w_ho, b_ho)

    scores = lstm_forward(tokens, params["emb_wih"], params["whh_t"], params["bias"],
                          params["who_t"], params["bho"], num_labels=V)
    scores = jax.block_until_ready(scores)
    assert scores.shape == (B, T, V)

    ref = jax.vmap(lambda tk: reference_forward(tk, emb, w_ih, w_hh, b_ih, b_hh,
                                                w_ho, b_ho))(tokens)
    # bf16 MXU operands with f32 accumulation -> looser tolerance than pure f32.
    np.testing.assert_allclose(np.asarray(scores), np.asarray(ref),
                               rtol=2e-2, atol=2e-2)
    print("KERNEL_OK")
</pallas_src>

<mosaic_0001>
module attributes {stable_mosaic.version = 11 : i64} {
  func.func @lstm_kernel(%arg0: i32, %arg1: memref<64x1xi32, #tpu.memory_space<vmem>>, %arg2: memref<64x512xbf16, #tpu.memory_space<vmem>>, %arg3: memref<128x512xbf16, #tpu.memory_space<vmem>>, %arg4: memref<1x512xf32, #tpu.memory_space<vmem>>, %arg5: memref<128x128xbf16, #tpu.memory_space<vmem>>, %arg6: memref<1x128xf32, #tpu.memory_space<vmem>>, %arg7: memref<64x128xf32, #tpu.memory_space<vmem>>, %arg8: memref<64x512xf32, #tpu.memory_space<vmem>>, %arg9: memref<64x128xf32, #tpu.memory_space<vmem>>) attributes {dimension_semantics = [#tpu.dimension_semantics<parallel>], iteration_bounds = array<i64: 2>, scalar_prefetch = 0 : i64, scratch_operands = 2 : i64, tpu.core_type = #tpu.core_type<tc>, window_params = [{transform_indices = @transform_0, window_bounds = array<i64: 64, 1>}, {pipeline_mode = #tpu.pipeline_mode<synchronous>, transform_indices = @transform_1, window_bounds = array<i64: 64, 512>}, {pipeline_mode = #tpu.pipeline_mode<synchronous>, transform_indices = @transform_2, window_bounds = array<i64: 128, 512>}, {pipeline_mode = #tpu.pipeline_mode<synchronous>, transform_indices = @transform_3, window_bounds = array<i64: 1, 512>}, {pipeline_mode = #tpu.pipeline_mode<synchronous>, transform_indices = @transform_4, window_bounds = array<i64: 128, 128>}, {pipeline_mode = #tpu.pipeline_mode<synchronous>, transform_indices = @transform_5, window_bounds = array<i64: 1, 128>}, {transform_indices = @transform_6, window_bounds = array<i64: 64, 128>}]} {
    %c0 = arith.constant 0 : index
    %c0_0 = arith.constant 0 : index
    %0 = vector.load %arg1[%c0, %c0_0] : memref<64x1xi32, #tpu.memory_space<vmem>>, vector<64x1xi32>
    %1 = tpu.iota {dimensions = array<i32: 1>} : vector<64x64xi32>
    %2 = vector.broadcast %0 : vector<64x1xi32> to vector<64x64xi32>
    %3 = arith.cmpi eq, %1, %2 : vector<64x64xi32>
    %4 = arith.extui %3 : vector<64x64xi1> to vector<64x64xi32>
    %5 = arith.sitofp %4 : vector<64x64xi32> to vector<64x64xf32>
    %6 = arith.truncf %5 : vector<64x64xf32> to vector<64x64xbf16>
    %c0_1 = arith.constant 0 : index
    %c0_2 = arith.constant 0 : index
    %7 = vector.load %arg2[%c0_1, %c0_2] : memref<64x512xbf16, #tpu.memory_space<vmem>>, vector<64x512xbf16>
    %cst = arith.constant dense<0.000000e+00> : vector<64x512xf32>
    %8 = tpu.matmul %6, %7, %cst {dimension_numbers = #tpu.dot_dimension_numbers<[1], [0], [0], [1], [0, 0, 1, 1], [], []>} : vector<64x64xbf16>, vector<64x512xbf16>, vector<64x512xf32> -> vector<64x512xf32>
    %c0_3 = arith.constant 0 : index
    %c0_4 = arith.constant 0 : index
    %9 = vector.load %arg4[%c0_3, %c0_4] : memref<1x512xf32, #tpu.memory_space<vmem>>, vector<1x512xf32>
    %10 = vector.broadcast %9 : vector<1x512xf32> to vector<64x512xf32>
    %11 = arith.addf %8, %10 : vector<64x512xf32>
    %c0_5 = arith.constant 0 : index
    %c0_6 = arith.constant 0 : index
    %12 = vector.load %arg8[%c0_5, %c0_6] : memref<64x512xf32, #tpu.memory_space<vmem>>, vector<64x512xf32>
    tpu.vector_store %arg8[%c0_5, %c0_6], %11 {strides = array<i32>} : memref<64x512xf32, #tpu.memory_space<vmem>>, vector<64x512xf32>,
    %cst_7 = arith.constant 0.000000e+00 : f32
    %13 = vector.broadcast %cst_7 : f32 to vector<8x128xf32>
    %cst_8 = arith.constant 0.000000e+00 : f32
    %14 = vector.broadcast %cst_8 : f32 to vector<8x128xf32>
    %c0_9 = arith.constant 0 : index
    %c0_10 = arith.constant 0 : index
    %15 = vector.load %arg8[%c0_9, %c0_10] : memref<64x512xf32, #tpu.memory_space<vmem>>, vector<8x512xf32>
    %16 = arith.truncf %13 : vector<8x128xf32> to vector<8x128xbf16>
    %c0_11 = arith.constant 0 : index
    %c0_12 = arith.constant 0 : index
    %17 = vector.load %arg3[%c0_11, %c0_12] : memref<128x512xbf16, #tpu.memory_space<vmem>>, vector<128x512xbf16>
    %cst_13 = arith.constant dense<0.000000e+00> : vector<8x512xf32>
    %18 = tpu.matmul %16, %17, %cst_13 {dimension_numbers = #tpu.dot_dimension_numbers<[1], [0], [0], [1], [0, 0, 1, 1], [], []>} : vector<8x128xbf16>, vector<128x512xbf16>, vector<8x512xf32> -> vector<8x512xf32>
    %19 = arith.addf %15, %18 : vector<8x512xf32>
    %20 = vector.extract_strided_slice %19 {offsets = [0, 0], sizes = [8, 384], strides = [1, 1]} : vector<8x512xf32> to vector<8x384xf32>
    %21 = arith.negf %20 : vector<8x384xf32>
    %22 = math.exp %21 : vector<8x384xf32>
    %cst_14 = arith.constant 1.000000e+00 : f32
    %23 = vector.broadcast %cst_14 : f32 to vector<8x384xf32>
    %24 = arith.addf %23, %22 : vector<8x384xf32>
    %25 = arith.divf %23, %24 : vector<8x384xf32>
    %26 = vector.extract_strided_slice %19 {offsets = [0, 384], sizes = [8, 128], strides = [1, 1]} : vector<8x512xf32> to vector<8x128xf32>
    %27 = math.tanh %26 : vector<8x128xf32>
    %28 = vector.extract_strided_slice %25 {offsets = [0, 0], sizes = [8, 128], strides = [1, 1]} : vector<8x384xf32> to vector<8x128xf32>
    %29 = vector.extract_strided_slice %25 {offsets = [0, 128], sizes = [8, 128], strides = [1, 1]} : vector<8x384xf32> to vector<8x128xf32>
    %30 = vector.extract_strided_slice %25 {offsets = [0, 256], sizes = [8, 128], strides = [1, 1]} : vector<8x384xf32> to vector<8x128xf32>
    %31 = arith.mulf %29, %14 : vector<8x128xf32>
    %32 = arith.mulf %28, %27 : vector<8x128xf32>
    %33 = arith.addf %31, %32 : vector<8x128xf32>
    %34 = math.tanh %33 : vector<8x128xf32>
    %35 = arith.mulf %30, %34 : vector<8x128xf32>
    %c0_15 = arith.constant 0 : index
    %c0_16 = arith.constant 0 : index
    %36 = vector.load %arg9[%c0_15, %c0_16] : memref<64x128xf32, #tpu.memory_space<vmem>>, vector<8x128xf32>
    tpu.vector_store %arg9[%c0_15, %c0_16], %35 {strides = array<i32>} : memref<64x128xf32, #tpu.memory_space<vmem>>, vector<8x128xf32>,
    %c8 = arith.constant 8 : index
    %c0_17 = arith.constant 0 : index
    %37 = vector.load %arg8[%c8, %c0_17] : memref<64x512xf32, #tpu.memory_space<vmem>>, vector<8x512xf32>
    %38 = arith.truncf %35 : vector<8x128xf32> to vector<8x128xbf16>
    %c0_18 = arith.constant 0 : index
    %c0_19 = arith.constant 0 : index
    %39 = vector.load %arg3[%c0_18, %c0_19] : memref<128x512xbf16, #tpu.memory_space<vmem>>, vector<128x512xbf16>
    %cst_20 = arith.constant dense<0.000000e+00> : vector<8x512xf32>
    %40 = tpu.matmul %38, %39, %cst_20 {dimension_numbers = #tpu.dot_dimension_numbers<[1], [0], [0], [1], [0, 0, 1, 1], [], []>} : vector<8x128xbf16>, vector<128x512xbf16>, vector<8x512xf32> -> vector<8x512xf32>
    %41 = arith.addf %37, %40 : vector<8x512xf32>
    %42 = vector.extract_strided_slice %41 {offsets = [0, 0], sizes = [8, 384], strides = [1, 1]} : vector<8x512xf32> to vector<8x384xf32>
    %43 = arith.negf %42 : vector<8x384xf32>
    %44 = math.exp %43 : vector<8x384xf32>
    %cst_21 = arith.constant 1.000000e+00 : f32
    %45 = vector.broadcast %cst_21 : f32 to vector<8x384xf32>
    %46 = arith.addf %45, %44 : vector<8x384xf32>
    %47 = arith.divf %45, %46 : vector<8x384xf32>
    %48 = vector.extract_strided_slice %41 {offsets = [0, 384], sizes = [8, 128], strides = [1, 1]} : vector<8x512xf32> to vector<8x128xf32>
    %49 = math.tanh %48 : vector<8x128xf32>
    %50 = vector.extract_strided_slice %47 {offsets = [0, 0], sizes = [8, 128], strides = [1, 1]} : vector<8x384xf32> to vector<8x128xf32>
    %51 = vector.extract_strided_slice %47 {offsets = [0, 128], sizes = [8, 128], strides = [1, 1]} : vector<8x384xf32> to vector<8x128xf32>
    %52 = vector.extract_strided_slice %47 {offsets = [0, 256], sizes = [8, 128], strides = [1, 1]} : vector<8x384xf32> to vector<8x128xf32>
    %53 = arith.mulf %51, %33 : vector<8x128xf32>
    %54 = arith.mulf %50, %49 : vector<8x128xf32>
    %55 = arith.addf %53, %54 : vector<8x128xf32>
    %56 = math.tanh %55 : vector<8x128xf32>
    %57 = arith.mulf %52, %56 : vector<8x128xf32>
    %c8_22 = arith.constant 8 : index
    %c0_23 = arith.constant 0 : index
    %58 = vector.load %arg9[%c8_22, %c0_23] : memref<64x128xf32, #tpu.memory_space<vmem>>, vector<8x128xf32>
    tpu.vector_store %arg9[%c8_22, %c0_23], %57 {strides = array<i32>} : memref<64x128xf32, #tpu.memory_space<vmem>>, vector<8x128xf32>,
    %c16 = arith.constant 16 : index
    %c0_24 = arith.constant 0 : index
    %59 = vector.load %arg8[%c16, %c0_24] : memref<64x512xf32, #tpu.memory_space<vmem>>, vector<8x512xf32>
    %60 = arith.truncf %57 : vector<8x128xf32> to vector<8x128xbf16>
    %c0_25 = arith.constant 0 : index
    %c0_26 = arith.constant 0 : index
    %61 = vector.load %arg3[%c0_25, %c0_26] : memref<128x512xbf16, #tpu.memory_space<vmem>>, vector<128x512xbf16>
    %cst_27 = arith.constant dense<0.000000e+00> : vector<8x512xf32>
    %62 = tpu.matmul %60, %61, %cst_27 {dimension_numbers = #tpu.dot_dimension_numbers<[1], [0], [0], [1], [0, 0, 1, 1], [], []>} : vector<8x128xbf16>, vector<128x512xbf16>, vector<8x512xf32> -> vector<8x512xf32>
    %63 = arith.addf %59, %62 : vector<8x512xf32>
    %64 = vector.extract_strided_slice %63 {offsets = [0, 0], sizes = [8, 384], strides = [1, 1]} : vector<8x512xf32> to vector<8x384xf32>
    %65 = arith.negf %64 : vector<8x384xf32>
    %66 = math.exp %65 : vector<8x384xf32>
    %cst_28 = arith.constant 1.000000e+00 : f32
    %67 = vector.broadcast %cst_28 : f32 to vector<8x384xf32>
    %68 = arith.addf %67, %66 : vector<8x384xf32>
    %69 = arith.divf %67, %68 : vector<8x384xf32>
    %70 = vector.extract_strided_slice %63 {offsets = [0, 384], sizes = [8, 128], strides = [1, 1]} : vector<8x512xf32> to vector<8x128xf32>
    %71 = math.tanh %70 : vector<8x128xf32>
    %72 = vector.extract_strided_slice %69 {offsets = [0, 0], sizes = [8, 128], strides = [1, 1]} : vector<8x384xf32> to vector<8x128xf32>
    %73 = vector.extract_strided_slice %69 {offsets = [0, 128], sizes = [8, 128], strides = [1, 1]} : vector<8x384xf32> to vector<8x128xf32>
    %74 = vector.extract_strided_slice %69 {offsets = [0, 256], sizes = [8, 128], strides = [1, 1]} : vector<8x384xf32> to vector<8x128xf32>
    %75 = arith.mulf %73, %55 : vector<8x128xf32>
    %76 = arith.mulf %72, %71 : vector<8x128xf32>
    %77 = arith.addf %75, %76 : vector<8x128xf32>
    %78 = math.tanh %77 : vector<8x128xf32>
    %79 = arith.mulf %74, %78 : vector<8x128xf32>
    %c16_29 = arith.constant 16 : index
    %c0_30 = arith.constant 0 : index
    %80 = vector.load %arg9[%c16_29, %c0_30] : memref<64x128xf32, #tpu.memory_space<vmem>>, vector<8x128xf32>
    tpu.vector_store %arg9[%c16_29, %c0_30], %79 {strides = array<i32>} : memref<64x128xf32, #tpu.memory_space<vmem>>, vector<8x128xf32>,
    %c24 = arith.constant 24 : index
    %c0_31 = arith.constant 0 : index
    %81 = vector.load %arg8[%c24, %c0_31] : memref<64x512xf32, #tpu.memory_space<vmem>>, vector<8x512xf32>
    %82 = arith.truncf %79 : vector<8x128xf32> to vector<8x128xbf16>
    %c0_32 = arith.constant 0 : index
    %c0_33 = arith.constant 0 : index
    %83 = vector.load %arg3[%c0_32, %c0_33] : memref<128x512xbf16, #tpu.memory_space<vmem>>, vector<128x512xbf16>
    %cst_34 = arith.constant dense<0.000000e+00> : vector<8x512xf32>
    %84 = tpu.matmul %82, %83, %cst_34 {dimension_numbers = #tpu.dot_dimension_numbers<[1], [0], [0], [1], [0, 0, 1, 1], [], []>} : vector<8x128xbf16>, vector<128x512xbf16>, vector<8x512xf32> -> vector<8x512xf32>
    %85 = arith.addf %81, %84 : vector<8x512xf32>
    %86 = vector.extract_strided_slice %85 {offsets = [0, 0], sizes = [8, 384], strides = [1, 1]} : vector<8x512xf32> to vector<8x384xf32>
    %87 = arith.negf %86 : vector<8x384xf32>
    %88 = math.exp %87 : vector<8x384xf32>
    %cst_35 = arith.constant 1.000000e+00 : f32
    %89 = vector.broadcast %cst_35 : f32 to vector<8x384xf32>
    %90 = arith.addf %89, %88 : vector<8x384xf32>
    %91 = arith.divf %89, %90 : vector<8x384xf32>
    %92 = vector.extract_strided_slice %85 {offsets = [0, 384], sizes = [8, 128], strides = [1, 1]} : vector<8x512xf32> to vector<8x128xf32>
    %93 = math.tanh %92 : vector<8x128xf32>
    %94 = vector.extract_strided_slice %91 {offsets = [0, 0], sizes = [8, 128], strides = [1, 1]} : vector<8x384xf32> to vector<8x128xf32>
    %95 = vector.extract_strided_slice %91 {offsets = [0, 128], sizes = [8, 128], strides = [1, 1]} : vector<8x384xf32> to vector<8x128xf32>
    %96 = vector.extract_strided_slice %91 {offsets = [0, 256], sizes = [8, 128], strides = [1, 1]} : vector<8x384xf32> to vector<8x128xf32>
    %97 = arith.mulf %95, %77 : vector<8x128xf32>
    %98 = arith.mulf %94, %93 : vector<8x128xf32>
    %99 = arith.addf %97, %98 : vector<8x128xf32>
    %100 = math.tanh %99 : vector<8x128xf32>
    %101 = arith.mulf %96, %100 : vector<8x128xf32>
    %c24_36 = arith.constant 24 : index
    %c0_37 = arith.constant 0 : index
    %102 = vector.load %arg9[%c24_36, %c0_37] : memref<64x128xf32, #tpu.memory_space<vmem>>, vector<8x128xf32>
    tpu.vector_store %arg9[%c24_36, %c0_37], %101 {strides = array<i32>} : memref<64x128xf32, #tpu.memory_space<vmem>>, vector<8x128xf32>,
    %c32 = arith.constant 32 : index
    %c0_38 = arith.constant 0 : index
    %103 = vector.load %arg8[%c32, %c0_38] : memref<64x512xf32, #tpu.memory_space<vmem>>, vector<8x512xf32>
    %104 = arith.truncf %101 : vector<8x128xf32> to vector<8x128xbf16>
    %c0_39 = arith.constant 0 : index
    %c0_40 = arith.constant 0 : index
    %105 = vector.load %arg3[%c0_39, %c0_40] : memref<128x512xbf16, #tpu.memory_space<vmem>>, vector<128x512xbf16>
    %cst_41 = arith.constant dense<0.000000e+00> : vector<8x512xf32>
    %106 = tpu.matmul %104, %105, %cst_41 {dimension_numbers = #tpu.dot_dimension_numbers<[1], [0], [0], [1], [0, 0, 1, 1], [], []>} : vector<8x128xbf16>, vector<128x512xbf16>, vector<8x512xf32> -> vector<8x512xf32>
    %107 = arith.addf %103, %106 : vector<8x512xf32>
    %108 = vector.extract_strided_slice %107 {offsets = [0, 0], sizes = [8, 384], strides = [1, 1]} : vector<8x512xf32> to vector<8x384xf32>
    %109 = arith.negf %108 : vector<8x384xf32>
    %110 = math.exp %109 : vector<8x384xf32>
    %cst_42 = arith.constant 1.000000e+00 : f32
    %111 = vector.broadcast %cst_42 : f32 to vector<8x384xf32>
    %112 = arith.addf %111, %110 : vector<8x384xf32>
    %113 = arith.divf %111, %112 : vector<8x384xf32>
    %114 = vector.extract_strided_slice %107 {offsets = [0, 384], sizes = [8, 128], strides = [1, 1]} : vector<8x512xf32> to vector<8x128xf32>
    %115 = math.tanh %114 : vector<8x128xf32>
    %116 = vector.extract_strided_slice %113 {offsets = [0, 0], sizes = [8, 128], strides = [1, 1]} : vector<8x384xf32> to vector<8x128xf32>
    %117 = vector.extract_strided_slice %113 {offsets = [0, 128], sizes = [8, 128], strides = [1, 1]} : vector<8x384xf32> to vector<8x128xf32>
    %118 = vector.extract_strided_slice %113 {offsets = [0, 256], sizes = [8, 128], strides = [1, 1]} : vector<8x384xf32> to vector<8x128xf32>
    %119 = arith.mulf %117, %99 : vector<8x128xf32>
    %120 = arith.mulf %116, %115 : vector<8x128xf32>
    %121 = arith.addf %119, %120 : vector<8x128xf32>
    %122 = math.tanh %121 : vector<8x128xf32>
    %123 = arith.mulf %118, %122 : vector<8x128xf32>
    %c32_43 = arith.constant 32 : index
    %c0_44 = arith.constant 0 : index
    %124 = vector.load %arg9[%c32_43, %c0_44] : memref<64x128xf32, #tpu.memory_space<vmem>>, vector<8x128xf32>
    tpu.vector_store %arg9[%c32_43, %c0_44], %123 {strides = array<i32>} : memref<64x128xf32, #tpu.memory_space<vmem>>, vector<8x128xf32>,
    %c40 = arith.constant 40 : index
    %c0_45 = arith.constant 0 : index
    %125 = vector.load %arg8[%c40, %c0_45] : memref<64x512xf32, #tpu.memory_space<vmem>>, vector<8x512xf32>
    %126 = arith.truncf %123 : vector<8x128xf32> to vector<8x128xbf16>
    %c0_46 = arith.constant 0 : index
    %c0_47 = arith.constant 0 : index
    %127 = vector.load %arg3[%c0_46, %c0_47] : memref<128x512xbf16, #tpu.memory_space<vmem>>, vector<128x512xbf16>
    %cst_48 = arith.constant dense<0.000000e+00> : vector<8x512xf32>
    %128 = tpu.matmul %126, %127, %cst_48 {dimension_numbers = #tpu.dot_dimension_numbers<[1], [0], [0], [1], [0, 0, 1, 1], [], []>} : vector<8x128xbf16>, vector<128x512xbf16>, vector<8x512xf32> -> vector<8x512xf32>
    %129 = arith.addf %125, %128 : vector<8x512xf32>
    %130 = vector.extract_strided_slice %129 {offsets = [0, 0], sizes = [8, 384], strides = [1, 1]} : vector<8x512xf32> to vector<8x384xf32>
    %131 = arith.negf %130 : vector<8x384xf32>
    %132 = math.exp %131 : vector<8x384xf32>
    %cst_49 = arith.constant 1.000000e+00 : f32
    %133 = vector.broadcast %cst_49 : f32 to vector<8x384xf32>
    %134 = arith.addf %133, %132 : vector<8x384xf32>
    %135 = arith.divf %133, %134 : vector<8x384xf32>
    %136 = vector.extract_strided_slice %129 {offsets = [0, 384], sizes = [8, 128], strides = [1, 1]} : vector<8x512xf32> to vector<8x128xf32>
    %137 = math.tanh %136 : vector<8x128xf32>
    %138 = vector.extract_strided_slice %135 {offsets = [0, 0], sizes = [8, 128], strides = [1, 1]} : vector<8x384xf32> to vector<8x128xf32>
    %139 = vector.extract_strided_slice %135 {offsets = [0, 128], sizes = [8, 128], strides = [1, 1]} : vector<8x384xf32> to vector<8x128xf32>
    %140 = vector.extract_strided_slice %135 {offsets = [0, 256], sizes = [8, 128], strides = [1, 1]} : vector<8x384xf32> to vector<8x128xf32>
    %141 = arith.mulf %139, %121 : vector<8x128xf32>
    %142 = arith.mulf %138, %137 : vector<8x128xf32>
    %143 = arith.addf %141, %142 : vector<8x128xf32>
    %144 = math.tanh %143 : vector<8x128xf32>
    %145 = arith.mulf %140, %144 : vector<8x128xf32>
    %c40_50 = arith.constant 40 : index
    %c0_51 = arith.constant 0 : index
    %146 = vector.load %arg9[%c40_50, %c0_51] : memref<64x128xf32, #tpu.memory_space<vmem>>, vector<8x128xf32>
    tpu.vector_store %arg9[%c40_50, %c0_51], %145 {strides = array<i32>} : memref<64x128xf32, #tpu.memory_space<vmem>>, vector<8x128xf32>,
    %c48 = arith.constant 48 : index
    %c0_52 = arith.constant 0 : index
    %147 = vector.load %arg8[%c48, %c0_52] : memref<64x512xf32, #tpu.memory_space<vmem>>, vector<8x512xf32>
    %148 = arith.truncf %145 : vector<8x128xf32> to vector<8x128xbf16>
    %c0_53 = arith.constant 0 : index
    %c0_54 = arith.constant 0 : index
    %149 = vector.load %arg3[%c0_53, %c0_54] : memref<128x512xbf16, #tpu.memory_space<vmem>>, vector<128x512xbf16>
    %cst_55 = arith.constant dense<0.000000e+00> : vector<8x512xf32>
    %150 = tpu.matmul %148, %149, %cst_55 {dimension_numbers = #tpu.dot_dimension_numbers<[1], [0], [0], [1], [0, 0, 1, 1], [], []>} : vector<8x128xbf16>, vector<128x512xbf16>, vector<8x512xf32> -> vector<8x512xf32>
    %151 = arith.addf %147, %150 : vector<8x512xf32>
    %152 = vector.extract_strided_slice %151 {offsets = [0, 0], sizes = [8, 384], strides = [1, 1]} : vector<8x512xf32> to vector<8x384xf32>
    %153 = arith.negf %152 : vector<8x384xf32>
    %154 = math.exp %153 : vector<8x384xf32>
    %cst_56 = arith.constant 1.000000e+00 : f32
    %155 = vector.broadcast %cst_56 : f32 to vector<8x384xf32>
    %156 = arith.addf %155, %154 : vector<8x384xf32>
    %157 = arith.divf %155, %156 : vector<8x384xf32>
    %158 = vector.extract_strided_slice %151 {offsets = [0, 384], sizes = [8, 128], strides = [1, 1]} : vector<8x512xf32> to vector<8x128xf32>
    %159 = math.tanh %158 : vector<8x128xf32>
    %160 = vector.extract_strided_slice %157 {offsets = [0, 0], sizes = [8, 128], strides = [1, 1]} : vector<8x384xf32> to vector<8x128xf32>
    %161 = vector.extract_strided_slice %157 {offsets = [0, 128], sizes = [8, 128], strides = [1, 1]} : vector<8x384xf32> to vector<8x128xf32>
    %162 = vector.extract_strided_slice %157 {offsets = [0, 256], sizes = [8, 128], strides = [1, 1]} : vector<8x384xf32> to vector<8x128xf32>
    %163 = arith.mulf %161, %143 : vector<8x128xf32>
    %164 = arith.mulf %160, %159 : vector<8x128xf32>
    %165 = arith.addf %163, %164 : vector<8x128xf32>
    %166 = math.tanh %165 : vector<8x128xf32>
    %167 = arith.mulf %162, %166 : vector<8x128xf32>
    %c48_57 = arith.constant 48 : index
    %c0_58 = arith.constant 0 : index
    %168 = vector.load %arg9[%c48_57, %c0_58] : memref<64x128xf32, #tpu.memory_space<vmem>>, vector<8x128xf32>
    tpu.vector_store %arg9[%c48_57, %c0_58], %167 {strides = array<i32>} : memref<64x128xf32, #tpu.memory_space<vmem>>, vector<8x128xf32>,
    %c56 = arith.constant 56 : index
    %c0_59 = arith.constant 0 : index
    %169 = vector.load %arg8[%c56, %c0_59] : memref<64x512xf32, #tpu.memory_space<vmem>>, vector<8x512xf32>
    %170 = arith.truncf %167 : vector<8x128xf32> to vector<8x128xbf16>
    %c0_60 = arith.constant 0 : index
    %c0_61 = arith.constant 0 : index
    %171 = vector.load %arg3[%c0_60, %c0_61] : memref<128x512xbf16, #tpu.memory_space<vmem>>, vector<128x512xbf16>
    %cst_62 = arith.constant dense<0.000000e+00> : vector<8x512xf32>
    %172 = tpu.matmul %170, %171, %cst_62 {dimension_numbers = #tpu.dot_dimension_numbers<[1], [0], [0], [1], [0, 0, 1, 1], [], []>} : vector<8x128xbf16>, vector<128x512xbf16>, vector<8x512xf32> -> vector<8x512xf32>
    %173 = arith.addf %169, %172 : vector<8x512xf32>
    %174 = vector.extract_strided_slice %173 {offsets = [0, 0], sizes = [8, 384], strides = [1, 1]} : vector<8x512xf32> to vector<8x384xf32>
    %175 = arith.negf %174 : vector<8x384xf32>
    %176 = math.exp %175 : vector<8x384xf32>
    %cst_63 = arith.constant 1.000000e+00 : f32
    %177 = vector.broadcast %cst_63 : f32 to vector<8x384xf32>
    %178 = arith.addf %177, %176 : vector<8x384xf32>
    %179 = arith.divf %177, %178 : vector<8x384xf32>
    %180 = vector.extract_strided_slice %173 {offsets = [0, 384], sizes = [8, 128], strides = [1, 1]} : vector<8x512xf32> to vector<8x128xf32>
    %181 = math.tanh %180 : vector<8x128xf32>
    %182 = vector.extract_strided_slice %179 {offsets = [0, 0], sizes = [8, 128], strides = [1, 1]} : vector<8x384xf32> to vector<8x128xf32>
    %183 = vector.extract_strided_slice %179 {offsets = [0, 128], sizes = [8, 128], strides = [1, 1]} : vector<8x384xf32> to vector<8x128xf32>
    %184 = vector.extract_strided_slice %179 {offsets = [0, 256], sizes = [8, 128], strides = [1, 1]} : vector<8x384xf32> to vector<8x128xf32>
    %185 = arith.mulf %183, %165 : vector<8x128xf32>
    %186 = arith.mulf %182, %181 : vector<8x128xf32>
    %187 = arith.addf %185, %186 : vector<8x128xf32>
    %188 = math.tanh %187 : vector<8x128xf32>
    %189 = arith.mulf %184, %188 : vector<8x128xf32>
    %c56_64 = arith.constant 56 : index
    %c0_65 = arith.constant 0 : index
    %190 = vector.load %arg9[%c56_64, %c0_65] : memref<64x128xf32, #tpu.memory_space<vmem>>, vector<8x128xf32>
    tpu.vector_store %arg9[%c56_64, %c0_65], %189 {strides = array<i32>} : memref<64x128xf32, #tpu.memory_space<vmem>>, vector<8x128xf32>,
    %c0_66 = arith.constant 0 : index
    %c0_67 = arith.constant 0 : index
    %191 = vector.load %arg9[%c0_66, %c0_67] : memref<64x128xf32, #tpu.memory_space<vmem>>, vector<64x128xf32>
    %192 = math.tanh %191 : vector<64x128xf32>
    %193 = arith.truncf %192 : vector<64x128xf32> to vector<64x128xbf16>
    %c0_68 = arith.constant 0 : index
    %c0_69 = arith.constant 0 : index
    %194 = vector.load %arg5[%c0_68, %c0_69] : memref<128x128xbf16, #tpu.memory_space<vmem>>, vector<128x128xbf16>
    %cst_70 = arith.constant dense<0.000000e+00> : vector<64x128xf32>
    %195 = tpu.matmul %193, %194, %cst_70 {dimension_numbers = #tpu.dot_dimension_numbers<[1], [0], [0], [1], [0, 0, 1, 1], [], []>} : vector<64x128xbf16>, vector<128x128xbf16>, vector<64x128xf32> -> vector<64x128xf32>
    %c0_71 = arith.constant 0 : index
    %c0_72 = arith.constant 0 : index
    %196 = vector.load %arg6[%c0_71, %c0_72] : memref<1x128xf32, #tpu.memory_space<vmem>>, vector<1x128xf32>
    %197 = vector.broadcast %196 : vector<1x128xf32> to vector<64x128xf32>
    %198 = arith.addf %195, %197 : vector<64x128xf32>
    %cst_73 = arith.constant dense<0xFF800000> : vector<64xf32>
    %199 = vector.multi_reduction <maximumf>, %198, %cst_73 [1] : vector<64x128xf32> to vector<64xf32>
    %200 = vector.shape_cast %199 : vector<64xf32> to vector<64x1xf32>
    %201 = vector.broadcast %200 : vector<64x1xf32> to vector<64x128xf32>
    %202 = arith.subf %198, %201 : vector<64x128xf32>
    %203 = math.exp %202 : vector<64x128xf32>
    %cst_74 = arith.constant dense<0.000000e+00> : vector<64xf32>
    %204 = vector.multi_reduction <add>, %203, %cst_74 [1] : vector<64x128xf32> to vector<64xf32>
    %205 = vector.shape_cast %204 : vector<64xf32> to vector<64x1xf32>
    %206 = math.log %205 : vector<64x1xf32>
    %207 = vector.broadcast %206 : vector<64x1xf32> to vector<64x128xf32>
    %208 = arith.subf %202, %207 : vector<64x128xf32>
    %c0_75 = arith.constant 0 : index
    %c0_76 = arith.constant 0 : index
    %209 = vector.load %arg7[%c0_75, %c0_76] : memref<64x128xf32, #tpu.memory_space<vmem>>, vector<64x128xf32>
    tpu.vector_store %arg7[%c0_75, %c0_76], %208 {strides = array<i32>} : memref<64x128xf32, #tpu.memory_space<vmem>>, vector<64x128xf32>,
    return
  }
  func.func @transform_0(%arg0: i32) -> (i32, i32) {
    %c0_i32 = arith.constant 0 : i32
    %c0_i32_0 = arith.constant 0 : i32
    return %arg0, %c0_i32 : i32, i32
  }
  func.func @transform_1(%arg0: i32) -> (i32, i32) {
    %c0_i32 = arith.constant 0 : i32
    %c0_i32_0 = arith.constant 0 : i32
    %c0_i32_1 = arith.constant 0 : i32
    return %c0_i32, %c0_i32_0 : i32, i32
  }
  func.func @transform_2(%arg0: i32) -> (i32, i32) {
    %c0_i32 = arith.constant 0 : i32
    %c0_i32_0 = arith.constant 0 : i32
    %c0_i32_1 = arith.constant 0 : i32
    return %c0_i32, %c0_i32_0 : i32, i32
  }
  func.func @transform_3(%arg0: i32) -> (i32, i32) {
    %c0_i32 = arith.constant 0 : i32
    %c0_i32_0 = arith.constant 0 : i32
    %c0_i32_1 = arith.constant 0 : i32
    return %c0_i32, %c0_i32_0 : i32, i32
  }
  func.func @transform_4(%arg0: i32) -> (i32, i32) {
    %c0_i32 = arith.constant 0 : i32
    %c0_i32_0 = arith.constant 0 : i32
    %c0_i32_1 = arith.constant 0 : i32
    return %c0_i32, %c0_i32_0 : i32, i32
  }
  func.func @transform_5(%arg0: i32) -> (i32, i32) {
    %c0_i32 = arith.constant 0 : i32
    %c0_i32_0 = arith.constant 0 : i32
    %c0_i32_1 = arith.constant 0 : i32
    return %c0_i32, %c0_i32_0 : i32, i32
  }
  func.func @transform_6(%arg0: i32) -> (i32, i32) {
    %c0_i32 = arith.constant 0 : i32
    %c0_i32_0 = arith.constant 0 : i32
    return %arg0, %c0_i32 : i32, i32
  }
}

</mosaic_0001>

<bundles_post_ra>
// kernel: lstm_forward.1
= control target key start
LH: loop header
LB: loop body
LE: loop exit
PB: predicated region body
PF: predicated region fallthrough
CT: control target
= control target key end

     0   :  { %11 = vsyncpa [#allocation5], 0  ;;  %s4220_s21 = smov 0   ;;  %s4959_s0 = inlined_call_operand.vmem [shape: s32[128,1], index: 0, kind: input, shape index: {}]   ;;  %s4960_s1 = inlined_call_operand.vmem [shape: bf16[64,512], index: 1, kind: input, shape index: {}]   ;;  %s4961_s2 = inlined_call_operand.hbm [shape: bf16[128,512], index: 2, kind: input, shape index: {}]   ;;  %s4962_s3 = inlined_call_operand.vmem [shape: f32[1,512], index: 3, kind: input, shape index: {}]   ;;  %s4963_s4 = inlined_call_operand.vmem [shape: bf16[128,128], index: 4, kind: input, shape index: {}]   ;;  %s4964_s5 = inlined_call_operand.vmem [shape: f32[1,128], index: 5, kind: input, shape index: {}]   ;;  %s4965_s6 = inlined_call_operand.vmem [shape: f32[128,128], index: 6, kind: output, shape index: {}]  }
   0x1 LB: > { %s3417_s22 = sadd.s32 4294967295, %s4178_s21   ;;  %p3419_p0 = scmp.ge.s32.totalorder %s4178_s21, 1  ;;  %s4178_s21 = sphi %s4220_s21, %s17_s21  }
   0x2   : > { %p179_p1 = scmp.lt.s32.totalorder %s4178_s21, 3  ;;  %s4180_s23 = smov [#allocation4]  }
   0x3   : > { %s194_s24 = sshll.u32 %s4180_s23, 4  ;;  %p4234_p3 = scmp.eq.s32.totalorder %s3417_s22, 0  ;;  %s195_s24 = int_to_ptr.vmem [resolvable:$true] %s194_s24 }
   0x4   : > { %p4228_p2 = pnand %p3419_p0, %p179_p1  ;;  %s4140_s30 = scalar_lea.hbm %s4961_s2, 4096 }
   0x5   : > { %s4972_s26 = scalar_select %p4234_p3, 1, 0 }
   0x6   : > { %s4971_s25 = scalar_select %p4228_p2, 1, 0 }
   0x7   : > { %p3791_p4 = pneg %p4228_p2  ;;  %p4141_p6 = scmp.ne.s32.totalorder %s4961_s2, %s4140_s30 }
   0x8   : > { %p4147_p10 = scmp.lt.u32.totalorder %s4140_s30, %s4961_s2 }
   0x9   : > { %p4242_p5 = pnand %p4234_p3, %p3791_p4 }
   0xb   : > { %p4142_p7 = pneg %p4242_p5 }
   0xd   : > { %p4143_p8 = pnand %p4142_p7, %p4141_p6 }
   0xf   : > { %p4144_p9 = pneg %p4143_p8 }
  0x11   : > { %p4149_p11 = pnand %p4147_p10, %p4144_p9 }
  0x13   : > { %4152 = shalt.err (!%p4149_p11)
}
  0x14   : > { %s4153_s11 = scalar_lea.vmem %s195_s24, 4096  ;;  %p4161_p1 = scmp.lt.s32.totalorder %s195_s24, %s195_s24 }
  0x15   : > { %p4154_p12 = scmp.ne.s32.totalorder %s195_s24, %s4153_s11  ;;  %p4162_p4 = scmp.lt.s32.totalorder %s4153_s11, %s4153_s11 }
  0x17   : > { %p4156_p13 = pnand %p4154_p12, %p4142_p7  ;;  %p4163_p3 = por %p4162_p4, %p4161_p1 }
  0x19   : > { %p4157_p0 = pneg %p4156_p13 }
  0x1b   : > { %p4164_p2 = pnand %p4163_p3, %p4157_p0 }
  0x1d   : > { %4167 = shalt.err (!%p4164_p2)
}
  0x1e   : > { %s4181_s12 = smov 256   ;;  %s4182_s13 = smov 16  }
  0x1f   : > { %3794 = dma.hbm_to_vmem [thread:$0]  (!%p4242_p5), %s4961_s2, 4096, %s195_s24, [#allocation5], %s4181_s12, %s4181_s12, %s4182_s13  }
  0x20   : > { %p4974_p6 = scmp.ne.s32.totalorder %s4971_s25, 0 }
  0x22   : > { %228 = sbr.rel (%p4974_p6) target bundleno = 2863 (0xb2f), region = 44 }
  0x29   : > { %p4975_p8 = scmp.ne.s32.totalorder %s4972_s26, 0 }
  0x2b   : > { %4173 = dma.done.wait (%p4975_p8), [#allocation5], 4096  }
  0x2c   : > { %4175 = vsyncadd (%p4975_p8), [#allocation5], 4294963200  ;;  %s3424_s16 = sshll.u32 %s3417_s22, 3  ;;  %v4969_v0 = vmov 0   ;;  %v4282_v5 = vld [vmem:[#allocation4 + $0x4] ss:$16 sps:$4 sm:$0xff]   ;;  %v279_v34 = vlaneseq }
  0x2d   : > { %3811 = vset.pattern.permute.xlu1 %v4969_v0  ;;  %3810 = vset.pattern.permute.xlu0 %v4969_v0  ;;  %p259_p2 = scmp.lt.s32.totalorder %s3424_s16, 15  ;;  %v4284_v6 = vld [vmem:[#allocation4] ss:$16 sps:$4 sm:$0xff]   ;;  %v4286_v7 = vld [vmem:[#allocation4 + $0x24] ss:$16 sps:$4 sm:$0xff]   ;;  %v4184_v39 = vmov 0.0  }
  0x2e   : > { %496 = vmatprep.mubr.bf16.mxu1 %v4969_v0  ;;  %870 = vmatprep.mubr.bf16.mxu0 %v4969_v0  ;;  %v4290_v10 = vld [vmem:[#allocation4 + $0x20] ss:$16 sps:$4 sm:$0xff]   ;;  %v4293_v12 = vld [vmem:[#allocation4 + $0x44] ss:$16 sps:$4 sm:$0xff]   ;;  %v3849_v28 = vld [vmem:[%s4960_s1 + $0xc] ss:$16 sps:$4 sm:$0xff]  }
  0x2f   : > { %s5008_s16 = smov (!%p259_p2, %s3424_s16), 15  ;;  %838 = vmatprep.subr.bf16.mxu0 %v4282_v5  ;;  %v3823_v13 = vld [vmem:[%s4960_s1 + $0x4] ss:$16 sps:$4 sm:$0xff]   ;;  %v3826_v14 = vld [vmem:[%s4960_s1] ss:$16 sps:$4 sm:$0xff]   ;;  %v280_v35 = vand.u32 127, %v279_v34 }
  0x30   : > { %s3425_s17 = sshll.u32 %s5008_s16, 3  ;;  %839 = vmatpush1.bf16.msra.mxu0 %v4284_v6  ;;  %464 = vmatprep.subr.bf16.mxu1 %v3823_v13  ;;  %v4302_v16 = vld [vmem:[#allocation4 + $0x40] ss:$16 sps:$4 sm:$0xff]   ;;  %v3829_v17 = vld [vmem:[%s4960_s1 + $0x24] ss:$16 sps:$4 sm:$0xff]   ;;  %vm451_vm2 = vcmask 523264  }
  0x31   : > { %s262_s20 = scalar_lea.vmem %s4959_s0, %s3425_s17  ;;  %840 = vmatprep.subr.bf16.mxu0 %v4286_v7  ;;  %465 = vmatpush1.bf16.msra.mxu1 %v3826_v14  ;;  %v3832_v18 = vld [vmem:[%s4960_s1 + $0x20] ss:$16 sps:$4 sm:$0xff]   ;;  %v4311_v19 = vld [vmem:[#allocation4 + $0x64] ss:$16 sps:$4 sm:$0xff]   ;;  %v3847_v42 = vld [vmem:[%s4960_s1 + $0x8] ss:$16 sps:$4 sm:$0xff]   ;;  %s4941_s10 = scalar_lea.vmem %s4965_s6, %s3425_s17 }
  0x32   : > { %v273_v1 = vld [vmem:[%s262_s20 + $0x10] sm:$0xff]  ;;  %v271_v2 = vld [vmem:[%s262_s20] sm:$0xff]  ;;  %v274_v3 = vld [vmem:[%s262_s20 + $0x18] sm:$0xff]  ;;  %466 = vmatprep.subr.bf16.mxu1 %v3829_v17 }
  0x33   : > { %288 = vperm.xlu1 %3811, %v273_v1   ;;  %282 = vperm.xlu0 %3810, %v271_v2   ;;  %v272_v4 = vld [vmem:[%s262_s20 + $0x8] sm:$0xff]  ;;  %v275_v9 = vld [vmem:[%s262_s20 + $0x20] sm:$0xff]  ;;  %v278_v11 = vld [vmem:[%s262_s20 + $0x38] sm:$0xff] }
  0x34   : > { %v276_v8 = vld [vmem:[%s262_s20 + $0x28] sm:$0xff]  ;;  %v277_v15 = vld [vmem:[%s262_s20 + $0x30] sm:$0xff]  ;;  %841 = vmatpush1.bf16.msra.mxu0 %v4290_v10 }
  0x35   : > { %842 = vmatprep.subr.bf16.mxu0 %v4293_v12  ;;  %v3835_v20 = vld [vmem:[%s4960_s1 + $0x44] ss:$16 sps:$4 sm:$0xff]   ;;  %v4316_v21 = vld [vmem:[#allocation4 + $0x60] ss:$16 sps:$4 sm:$0xff]   ;;  %467 = vmatpush1.bf16.msra.mxu1 %v3832_v18  ;;  %v3853_v44 = vld [vmem:[%s4960_s1 + $0x2c] ss:$16 sps:$4 sm:$0xff]  }
  0x36   : > { %v3838_v22 = vld [vmem:[%s4960_s1 + $0x40] ss:$16 sps:$4 sm:$0xff]   ;;  %v4323_v23 = vld [vmem:[#allocation4 + $0x84] ss:$16 sps:$4 sm:$0xff]   ;;  %468 = vmatprep.subr.bf16.mxu1 %v3835_v20  ;;  %v3851_v46 = vld [vmem:[%s4960_s1 + $0x28] ss:$16 sps:$4 sm:$0xff]  }
  0x37   : > { %291 = vperm.xlu1 %3811, %v274_v3   ;;  %285 = vperm.xlu0 %3810, %v272_v4   ;;  %v3841_v24 = vld [vmem:[%s4960_s1 + $0x64] ss:$16 sps:$4 sm:$0xff]   ;;  %v4329_v25 = vld [vmem:[#allocation4 + $0x80] ss:$16 sps:$4 sm:$0xff]   ;;  %v3856_v47 = vld [vmem:[%s4960_s1 + $0x4c] ss:$16 sps:$4 sm:$0xff]  }
  0x38   : > { %843 = vmatpush1.bf16.msra.mxu0 %v4302_v16  ;;  %v4331_v26 = vld [vmem:[#allocation4 + $0xa4] ss:$16 sps:$4 sm:$0xff]   ;;  %v3844_v27 = vld [vmem:[%s4960_s1 + $0x60] ss:$16 sps:$4 sm:$0xff]   ;;  %v3854_v52 = vld [vmem:[%s4960_s1 + $0x48] ss:$16 sps:$4 sm:$0xff]  }
  0x39   : > { %844 = vmatprep.subr.bf16.mxu0 %v4311_v19  ;;  %469 = vmatpush1.bf16.msra.mxu1 %v3838_v22  ;;  %v4340_v29 = vld [vmem:[#allocation4 + $0xa0] ss:$16 sps:$4 sm:$0xff]   ;;  %v4342_v30 = vld [vmem:[#allocation4 + $0xc4] ss:$16 sps:$4 sm:$0xff]   ;;  %v3859_v54 = vld [vmem:[%s4960_s1 + $0x6c] ss:$16 sps:$4 sm:$0xff]  }
  0x3a   : > { %470 = vmatprep.subr.bf16.mxu1 %v3841_v24  ;;  %v4346_v31 = vld [vmem:[#allocation4 + $0xc0] ss:$16 sps:$4 sm:$0xff]   ;;  %v4348_v32 = vld [vmem:[#allocation4 + $0xe4] ss:$16 sps:$4 sm:$0xff]   ;;  %v3857_v55 = vld [vmem:[%s4960_s1 + $0x68] ss:$16 sps:$4 sm:$0xff]  }
  0x3b   : > { %297 = vperm.xlu1 %3811, %v276_v8   ;;  %294 = vperm.xlu0 %3810, %v275_v9   ;;  %v4352_v33 = vld [vmem:[#allocation4 + $0xe0] ss:$16 sps:$4 sm:$0xff]   ;;  %v4402_v56 = vld [vmem:[#allocation4 + $0xc] ss:$16 sps:$4 sm:$0xff]   ;;  %v4409_v2 = vld [vmem:[#allocation4 + $0x8] ss:$16 sps:$4 sm:$0xff]  }
  0x3c   : > { %845 = vmatpush1.bf16.msra.mxu0 %v4316_v21  ;;  %v4411_v3 = vld [vmem:[#allocation4 + $0x2c] ss:$16 sps:$4 sm:$0xff]   ;;  %v4415_v4 = vld [vmem:[#allocation4 + $0x28] ss:$16 sps:$4 sm:$0xff]  }
  0x3d   : > { %846 = vmatprep.subr.bf16.mxu0 %v4323_v23  ;;  %471 = vmatpush1.bf16.msra.mxu1 %v3844_v27  ;;  %v4422_v8 = vld [vmem:[#allocation4 + $0x48] ss:$16 sps:$4 sm:$0xff]   ;;  %v4425_v9 = vld [vmem:[#allocation4 + $0x6c] ss:$16 sps:$4 sm:$0xff]  }
  0x3e   : > { %537 = vmatprep.subr.bf16.mxu1 %v3849_v28  ;;  %v4433_v13 = vld [vmem:[#allocation4 + $0x8c] ss:$16 sps:$4 sm:$0xff]   ;;  %v4436_v14 = vld [vmem:[#allocation4 + $0x88] ss:$16 sps:$4 sm:$0xff]  }
  0x3f   : > { %303 = vperm.xlu1 %3811, %v278_v11   ;;  %300 = vperm.xlu0 %3810, %v277_v15   ;;  %v4429_v11 = vld [vmem:[#allocation4 + $0x68] ss:$16 sps:$4 sm:$0xff]   ;;  %v4439_v15 = vld [vmem:[#allocation4 + $0xac] ss:$16 sps:$4 sm:$0xff]  }
  0x40   : > { %847 = vmatpush1.bf16.msra.mxu0 %v4329_v25  ;;  %v4443_v17 = vld [vmem:[#allocation4 + $0xa8] ss:$16 sps:$4 sm:$0xff]   ;;  %v4447_v18 = vld [vmem:[#allocation4 + $0xcc] ss:$16 sps:$4 sm:$0xff]  }
  0x41   : > { %848 = vmatprep.subr.bf16.mxu0 %v4331_v26  ;;  %v4450_v20 = vld [vmem:[#allocation4 + $0xc8] ss:$16 sps:$4 sm:$0xff]   ;;  %v4453_v22 = vld [vmem:[#allocation4 + $0xec] ss:$16 sps:$4 sm:$0xff]  }
  0x42   : > { %v4457_v24 = vld [vmem:[#allocation4 + $0xe8] ss:$16 sps:$4 sm:$0xff]  }
  0x44   : > { %849 = vmatpush1.bf16.msra.mxu0 %v4340_v29 }
  0x45   : > { %850 = vmatprep.subr.bf16.mxu0 %v4342_v30 }
  0x48   : > { %851 = vmatpush1.bf16.msra.mxu0 %v4346_v31 }
  0x49   : > { %852 = vmatprep.subr.bf16.mxu0 %v4348_v32 }
  0x4c   : > { %853 = vmatpush1.bf16.msra.mxu0 %v4352_v33 }
  0x4d   : > { %1146 = vmatprep.subr.bf16.mxu0 %v4282_v5 }
  0x4f   : > { %871 = vmatmul.mubr.bf16.vlgmr.msra.gmra.mrb[0].mxu0 %v4969_v0 }
  0x50   : > { %1147 = vmatpush1.bf16.msra.mxu0 %v4284_v6  ;;  %1178 = vmatprep.mubr.bf16.mxu0 %v4969_v0 }
  0x51   : > { %1148 = vmatprep.subr.bf16.mxu0 %v4286_v7 }
  0x54   : > { %1149 = vmatpush1.bf16.msra.mxu0 %v4290_v10 }
  0x55   : > { %1150 = vmatprep.subr.bf16.mxu0 %v4293_v12 }
  0x58   : > { %1151 = vmatpush1.bf16.msra.mxu0 %v4302_v16 }
  0x59   : > { %1152 = vmatprep.subr.bf16.mxu0 %v4311_v19 }
  0x5c   : > { %1153 = vmatpush1.bf16.msra.mxu0 %v4316_v21 }
  0x5d   : > { %1154 = vmatprep.subr.bf16.mxu0 %v4323_v23 }
  0x60   : > { %1155 = vmatpush1.bf16.msra.mxu0 %v4329_v25 }
  0x61   : > { %1156 = vmatprep.subr.bf16.mxu0 %v4331_v26 }
  0x64   : > { %1157 = vmatpush1.bf16.msra.mxu0 %v4340_v29 }
  0x65   : > { %1158 = vmatprep.subr.bf16.mxu0 %v4342_v30 }
  0x68   : > { %1159 = vmatpush1.bf16.msra.mxu0 %v4346_v31 }
  0x69   : > { %1160 = vmatprep.subr.bf16.mxu0 %v4348_v32 }
  0x6c   : > { %1161 = vmatpush1.bf16.msra.mxu0 %v4352_v33 }
  0x6d   : > { %1454 = vmatprep.subr.bf16.mxu0 %v4282_v5  ;;  %v4419_v5 = vld [vmem:[#allocation4 + $0x4c] ss:$16 sps:$4 sm:$0xff]  }
  0xb2   : > { %v283_v36 = vpop.permute.xlu0 %282  ;;  %v289_v37 = vpop.permute.xlu1 %288 }
  0xb3   : > { %vm305_vm0 = vcmp.eq.s32.totalorder %v280_v35, %v283_v36  ;;  %vm307_vm3 = vcmp.eq.s32.totalorder %v280_v35, %v289_v37  ;;  %v352_v37 = vshrl.u32 %v279_v34, 7 }
  0xb4   : > { %v3428_v40 = vsel %vm305_vm0, 1.0, %v4184_v39  ;;  %v3430_v48 = vsel %vm307_vm3, 1.0, %v4184_v39 }
  0xb6   : > { %v286_v38 = vpop.permute.xlu0 %285  ;;  %v292_v45 = vpop.permute.xlu1 %291 }
  0xb7   : > { %vm306_vm1 = vcmp.eq.s32.totalorder %v280_v35, %v286_v38  ;;  %vm308_vm4 = vcmp.eq.s32.totalorder %v280_v35, %v292_v45  ;;  %v353_v38 = vsub.s32 0, %v352_v37 }
  0xb8   : > { %v3429_v41 = vsel %vm306_vm1, 1.0, %v4184_v39  ;;  %v3431_v49 = vsel %vm308_vm4, 1.0, %v4184_v39 }
  0xb9   : > { %v329_v43 = vpack.c.bf16 %v3429_v41, %v3428_v40  ;;  %v330_v53 = vpack.c.bf16 %v3431_v49, %v3430_v48  ;;  %v357_v40 = vsub.s32 1, %v352_v37 }
  0xba   : > { %v298_v50 = vpop.permute.xlu1 %297  ;;  %v295_v51 = vpop.permute.xlu0 %294 }
  0xbb   : > { %3452 = vmatmul.mubr.msk.bf16.vlgmr.msra.gmra.mrb[0].mxu1 %vm451_vm2, %v329_v43  ;;  %vm310_vm5 = vcmp.eq.s32.totalorder %v280_v35, %v298_v50  ;;  %vm309_vm6 = vcmp.eq.s32.totalorder %v280_v35, %v295_v51 }
  0xbc   : > { %538 = vmatpush1.bf16.msra.mxu1 %v3847_v42  ;;  %506 = vmatprep.mubr.bf16.mxu1 %v4969_v0  ;;  %v3433_v57 = vsel %vm310_vm5, 1.0, %v4184_v39  ;;  %v3432_v58 = vsel %vm309_vm6, 1.0, %v4184_v39 }
  0xbd   : > { %539 = vmatprep.subr.bf16.mxu1 %v3853_v44  ;;  %v331_v61 = vpack.c.bf16 %v3433_v57, %v3432_v58 }
  0xbe   : > { %v304_v59 = vpop.permute.xlu1 %303  ;;  %v301_v60 = vpop.permute.xlu0 %300 }
  0xbf   : > { %vm312_vm7 = vcmp.eq.s32.totalorder %v280_v35, %v304_v59  ;;  %vm311_vm8 = vcmp.eq.s32.totalorder %v280_v35, %v301_v60 }
  0xc0   : > { %540 = vmatpush1.bf16.msra.mxu1 %v3851_v46  ;;  %v3435_v62 = vsel %vm312_vm7, 1.0, %v4184_v39  ;;  %v3434_v63 = vsel %vm311_vm8, 1.0, %v4184_v39  ;;  %v349_v39 = vld [vmem:[%s4962_s3] sm:$0xf] }
  0xc1   : > { %541 = vmatprep.subr.bf16.mxu1 %v3856_v47  ;;  %v332_v1 = vpack.c.bf16 %v3435_v62, %v3434_v63  ;;  %v354_v41 = vrot.slane %v349_v39, %v353_v38  ;;  %v358_v42 = vrot.slane %v349_v39, %v357_v40 }
  0xc3   : > { %3453 = vmatmul.mubr.msk.bf16.gmra.mrb[4].mxu1 %vm451_vm2, %v330_v53 }
  0xc4   : > { %516 = vmatprep.mubr.bf16.mxu1 %v4969_v0  ;;  %542 = vmatpush1.bf16.msra.mxu1 %v3854_v52 }
  0xc5   : > { %543 = vmatprep.subr.bf16.mxu1 %v3859_v54 }
  0xc8   : > { %544 = vmatpush1.bf16.msra.mxu1 %v3857_v55 }
  0xc9   : > { %879 = vmatprep.subr.bf16.mxu1 %v4402_v56 }
  0xcb   : > { %3454 = vmatmul.mubr.msk.bf16.gmra.mrb[8].mxu1 %vm451_vm2, %v331_v61 }
  0xcc   : > { %526 = vmatprep.mubr.bf16.mxu1 %v4969_v0 }
  0xd3   : > { %3455 = vmatmul.mubr.msk.bf16.gmra.mrb[12].mxu1 %vm451_vm2, %v332_v1 }
  0xd4   : > { %569 = vmatprep.mubr.bf16.mxu1 %v4969_v0 }
  0xdb   : > { %3456 = vmatmul.mubr.msk.bf16.vlgmr.msra.gmra.mrb[16].mxu1 %vm451_vm2, %v329_v43 }
  0xdc   : > { %880 = vmatpush1.bf16.msra.mxu1 %v4409_v2  ;;  %579 = vmatprep.mubr.bf16.mxu1 %v4969_v0 }
  0xdd   : > { %881 = vmatprep.subr.bf16.mxu1 %v4411_v3 }
  0xe0   : > { %882 = vmatpush1.bf16.msra.mxu1 %v4415_v4 }
  0xe1   : > { %883 = vmatprep.subr.bf16.mxu1 %v4419_v5 }
  0xe3   : > { %3457 = vmatmul.mubr.msk.bf16.gmra.mrb[20].mxu1 %vm451_vm2, %v330_v53 }
  0xe4   : > { %884 = vmatpush1.bf16.msra.mxu1 %v4422_v8  ;;  %589 = vmatprep.mubr.bf16.mxu1 %v4969_v0 }
  0xe5   : > { %885 = vmatprep.subr.bf16.mxu1 %v4425_v9 }
  0xe8   : > { %886 = vmatpush1.bf16.msra.mxu1 %v4429_v11 }
  0xe9   : > { %887 = vmatprep.subr.bf16.mxu1 %v4433_v13 }
  0xeb   : > { %3458 = vmatmul.mubr.msk.bf16.gmra.mrb[24].mxu1 %vm451_vm2, %v331_v61 }
  0xec   : > { %888 = vmatpush1.bf16.msra.mxu1 %v4436_v14  ;;  %599 = vmatprep.mubr.bf16.mxu1 %v4969_v0 }
  0xed   : > { %889 = vmatprep.subr.bf16.mxu1 %v4439_v15 }
  0xf0   : > { %890 = vmatpush1.bf16.msra.mxu1 %v4443_v17 }
  0xf1   : > { %891 = vmatprep.subr.bf16.mxu1 %v4447_v18 }
  0xf3   : > { %3459 = vmatmul.mubr.msk.bf16.gmra.mrb[28].mxu1 %vm451_vm2, %v332_v1 }
  0xf4   : > { %892 = vmatpush1.bf16.msra.mxu1 %v4450_v20  ;;  %911 = vmatprep.mubr.bf16.mxu1 %v4969_v0 }
  0xf5   : > { %893 = vmatprep.subr.bf16.mxu1 %v4453_v22 }
  0xf8   : > { %894 = vmatpush1.bf16.msra.mxu1 %v4457_v24 }
  0xf9   : > { %1187 = vmatprep.subr.bf16.mxu1 %v4402_v56 }
  0xfb   : > { %912 = vmatmul.mubr.bf16.vlgmr.msra.gmra.mrb[32].mxu1 %v4969_v0 }
  0xfc   : > { %1188 = vmatpush1.bf16.msra.mxu1 %v4409_v2  ;;  %1219 = vmatprep.mubr.bf16.mxu1 %v4969_v0 }
  0xfd   : > { %1189 = vmatprep.subr.bf16.mxu1 %v4411_v3 }
 0x100   : > { %1190 = vmatpush1.bf16.msra.mxu1 %v4415_v4 }
 0x101   : > { %1191 = vmatprep.subr.bf16.mxu1 %v4419_v5 }
 0x104   : > { %1192 = vmatpush1.bf16.msra.mxu1 %v4422_v8 }
 0x105   : > { %1193 = vmatprep.subr.bf16.mxu1 %v4425_v9 }
 0x108   : > { %1194 = vmatpush1.bf16.msra.mxu1 %v4429_v11 }
 0x109   : > { %1195 = vmatprep.subr.bf16.mxu1 %v4433_v13 }
 0x10c   : > { %1196 = vmatpush1.bf16.msra.mxu1 %v4436_v14 }
 0x10d   : > { %1197 = vmatprep.subr.bf16.mxu1 %v4439_v15 }
 0x110   : > { %1198 = vmatpush1.bf16.msra.mxu1 %v4443_v17 }
 0x111   : > { %1199 = vmatprep.subr.bf16.mxu1 %v4447_v18 }
 0x114   : > { %1200 = vmatpush1.bf16.msra.mxu1 %v4450_v20 }
 0x115   : > { %1201 = vmatprep.subr.bf16.mxu1 %v4453_v22 }
 0x118   : > { %1202 = vmatpush1.bf16.msra.mxu1 %v4457_v24 }
 0x119   : > { %1495 = vmatprep.subr.bf16.mxu1 %v4402_v56 }
 0x122   : > { %v872_v27 = vpop.f32.mrb[0].mxu0 }
 0x123   : > { %v874_v28 = vpop.f32.mrb[1].mxu0 }
 0x124   : > { %v876_v35 = vpop.f32.mrb[2].mxu0 }
 0x125   : > { %v877_v36 = vpop.f32.mrb[3].mxu0 }
 0x18e   : > { %v498_v43 = vpop.f32.mrb[0].mxu1 }
 0x18f   : > { %v499_v44 = vadd.f32 %v498_v43, %v354_v41  ;;  %v500_v45 = vpop.f32.mrb[1].mxu1 }
 0x190   : > { %v501_v46 = vadd.f32 %v500_v45, %v358_v42  ;;  %v502_v47 = vpop.f32.mrb[2].mxu1 }
 0x191   : > { %v4485_v48 = vadd.f32 %v502_v47, %v354_v41  ;;  %v920_v49 = vadd.f32 %v872_v27, %v499_v44  ;;  %v504_v50 = vpop.f32.mrb[3].mxu1  ;;  %v361_v44 = vsub.s32 2, %v352_v37  ;;  %v365_v47 = vsub.s32 3, %v352_v37 }
 0x192   : > { %v4487_v51 = vadd.f32 %v504_v50, %v358_v42  ;;  %v921_v34 = vadd.f32 %v874_v28, %v501_v46 }
 0x196   : > { %v508_v52 = vpop.f32.mrb[4].mxu1 }
 0x197   : > { %v4489_v53 = vadd.f32 %v508_v52, %v354_v41  ;;  %v510_v54 = vpop.f32.mrb[5].mxu1 }
 0x198   : > { %v4491_v55 = vadd.f32 %v510_v54, %v358_v42  ;;  %v512_v57 = vpop.f32.mrb[6].mxu1 }
 0x199   : > { %v4493_v58 = vadd.f32 %v512_v57, %v354_v41  ;;  %v514_v59 = vpop.f32.mrb[7].mxu1  ;;  %v362_v57 = vrot.slane %v349_v39, %v361_v44 }
 0x19a   : > { %v4495_v60 = vadd.f32 %v514_v59, %v358_v42  ;;  %v366_v59 = vrot.slane %v349_v39, %v365_v47  ;;  %v3493_v47 = vmul.f32 -1.442695, %v921_v34 }
 0x19c   : > { %3964 = vpow2.f32 %v3493_v47 }
 0x19e   : > { %v518_v61 = vpop.f32.mrb[8].mxu1 }
 0x19f   : > { %v4497_v62 = vadd.f32 %v518_v61, %v354_v41  ;;  %v520_v63 = vpop.f32.mrb[9].mxu1 }
 0x1a0   : > { %v4499_v1 = vadd.f32 %v520_v63, %v358_v42  ;;  %v522_v27 = vpop.f32.mrb[10].mxu1 }
 0x1a1   : > { %4976 = vst [vmem:[#allocation7_spill] sm:$0xff] %v4497_v62  ;;  %v4501_v28 = vadd.f32 %v522_v27, %v354_v41  ;;  %v524_v35 = vpop.f32.mrb[11].mxu1 }
 0x1a2   : > { %4977 = vst [vmem:[#allocation8_spill] sm:$0xff] %v4499_v1  ;;  %v4503_v36 = vadd.f32 %v524_v35, %v358_v42 }
 0x1a3   : > { %4978 = vst [vmem:[#allocation9_spill] sm:$0xff] %v4501_v28 }
 0x1a4   : > { %4979 = vst [vmem:[#allocation10_spill] sm:$0xff] %v4503_v36 }
 0x1a6   : > { %v528_v38 = vpop.f32.mrb[12].mxu1  ;;  %v3965_v47 = vpop.eup %3964 }
 0x1a7   : > { %v4505_v40 = vadd.f32 %v528_v38, %v354_v41  ;;  %v530_v43 = vpop.f32.mrb[13].mxu1 }
 0x1a8   : > { %v4507_v45 = vadd.f32 %v530_v43, %v358_v42  ;;  %v532_v46 = vpop.f32.mrb[14].mxu1 }
 0x1a9   : > { %4980 = vst [vmem:[#allocation11_spill] sm:$0xff] %v4505_v40  ;;  %v4509_v50 = vadd.f32 %v532_v46, %v354_v41  ;;  %v534_v52 = vpop.f32.mrb[15].mxu1 }
 0x1aa   : > { %4981 = vst [vmem:[#allocation12_spill] sm:$0xff] %v4507_v45  ;;  %v4511_v54 = vadd.f32 %v534_v52, %v358_v42  ;;  %v3492_v52 = vmul.f32 -1.442695, %v920_v49 }
 0x1ab   : > { %4982 = vst [vmem:[#allocation13_spill] sm:$0xff] %v4509_v50 }
 0x1ac   : > { %4983 = vst [vmem:[#allocation14_spill] sm:$0xff] %v4511_v54  ;;  %3966 = vpow2.f32 %v3492_v52 }
 0x1ae   : > { %v571_v61 = vpop.f32.mrb[16].mxu1 }
 0x1af   : > { %v572_v63 = vadd.f32 %v571_v61, %v362_v57  ;;  %v573_v27 = vpop.f32.mrb[17].mxu1 }
 0x1b0   : > { %v574_v35 = vadd.f32 %v573_v27, %v366_v59  ;;  %v575_v0 = vpop.f32.mrb[18].mxu1 }
 0x1b1   : > { %v4513_v38 = vadd.f32 %v575_v0, %v362_v57  ;;  %v577_v40 = vpop.f32.mrb[19].mxu1 }
 0x1b2   : > { %v4515_v36 = vadd.f32 %v577_v40, %v366_v59 }
 0x1b6   : > { %v581_v43 = vpop.f32.mrb[20].mxu1  ;;  %v3967_v52 = vpop.eup %3966 }
 0x1b7   : > { %v4517_v45 = vadd.f32 %v581_v43, %v362_v57  ;;  %v583_v37 = vpop.f32.mrb[21].mxu1 }
 0x1b8   : > { %v4519_v41 = vadd.f32 %v583_v37, %v366_v59  ;;  %v585_v42 = vpop.f32.mrb[22].mxu1 }
 0x1b9   : > { %v4521_v46 = vadd.f32 %v585_v42, %v362_v57  ;;  %v587_v39 = vpop.f32.mrb[23].mxu1 }
 0x1ba   : > { %v4523_v44 = vadd.f32 %v587_v39, %v366_v59 }
 0x1be   : > { %v591_v61 = vpop.f32.mrb[24].mxu1 }
 0x1bf   : > { %v4525_v0 = vadd.f32 %v591_v61, %v362_v57  ;;  %v593_v40 = vpop.f32.mrb[25].mxu1 }
 0x1c0   : > { %v4527_v27 = vadd.f32 %v593_v40, %v366_v59  ;;  %v595_v43 = vpop.f32.mrb[26].mxu1 }
 0x1c1   : > { %4984 = vst [vmem:[#allocation15_spill] sm:$0xff] %v4525_v0  ;;  %v4529_v54 = vadd.f32 %v595_v43, %v362_v57  ;;  %v597_v37 = vpop.f32.mrb[27].mxu1  ;;  %v933_v43 = vadd.f32 1.0, %v3967_v52 }
 0x1c2   : > { %4985 = vst [vmem:[#allocation16_spill] sm:$0xff] %v4527_v27  ;;  %v4531_v50 = vadd.f32 %v597_v37, %v366_v59  ;;  %v934_v27 = vadd.f32 1.0, %v3965_v47 }
 0x1c3   : > { %4986 = vst [vmem:[#allocation17_spill] sm:$0xff] %v4529_v54 }
 0x1c4   : > { %4987 = vst [vmem:[#allocation18_spill] sm:$0xff] %v4531_v50  ;;  %3968 = vrcp.f32 %v934_v27 }
 0x1c5   : > { %3970 = vrcp.f32 %v933_v43 }
 0x1c6   : > { %v601_v42 = vpop.f32.mrb[28].mxu1 }
 0x1c7   : > { %v4533_v28 = vadd.f32 %v601_v42, %v362_v57  ;;  %v603_v39 = vpop.f32.mrb[29].mxu1 }
 0x1c8   : > { %v4535_v34 = vadd.f32 %v603_v39, %v366_v59  ;;  %v605_v49 = vpop.f32.mrb[30].mxu1 }
 0x1c9   : > { %4988 = vst [vmem:[#allocation19_spill] sm:$0xff] %v4533_v28  ;;  %v4537_v61 = vadd.f32 %v605_v49, %v362_v57  ;;  %v607_v1 = vpop.f32.mrb[31].mxu1 }
 0x1ca   : > { %4989 = vst [vmem:[#allocation20_spill] sm:$0xff] %v4535_v34  ;;  %v4539_v40 = vadd.f32 %v607_v1, %v366_v59 }
 0x1cb   : > { %4990 = vst [vmem:[#allocation21_spill] sm:$0xff] %v4537_v61 }
 0x1ce   : > { %v913_v54 = vpop.f32.mrb[32].mxu1  ;;  %v3969_v34 = vpop.eup %3968 }
 0x1cf   : > { %v922_v0 = vadd.f32 %v913_v54, %v572_v63  ;;  %v915_v37 = vpop.f32.mrb[33].mxu1  ;;  %v3971_v57 = vpop.eup %3970  ;;  %v943_v62 = vmul.f32 0.0, %v3969_v34 }
 0x1d0   : > { %v923_v50 = vadd.f32 %v915_v37, %v574_v35  ;;  %v917_v42 = vpop.f32.mrb[34].mxu1 }
 0x1d1   : > { %v3494_v28 = vmul.f32 -1.442695, %v922_v0  ;;  %v918_v39 = vpop.f32.mrb[35].mxu1 }
 0x1d2   : > { %3972 = vtanh.f32 %v923_v50 }
 0x1d3   : > { %3974 = vpow2.f32 %v3494_v28 }
 0x1dc   : > { %v3973_v49 = vpop.eup %3972 }
 0x1dd   : > { %v3975_v61 = vpop.eup %3974  ;;  %v944_v1 = vmul.f32 %v3973_v49, %v3971_v57 }
 0x1de   : > { %v935_v59 = vadd.f32 1.0, %v3975_v61 }
 0x1df   : > { %v4541_v47 = vadd.f32 %v944_v1, %v943_v62  ;;  %v4991_v62 = vmov 0  }
 0x1e0   : > { %3976 = vrcp.f32 %v935_v59 }
 0x1e1   : > { %3978 = vtanh.f32 %v4541_v47 }
 0x1ea   : > { %v3977_v54 = vpop.eup %3976 }
 0x1eb   : > { %v3979_v63 = vpop.eup %3978 }
 0x1ec   : > { %v4544_v35 = vmul.f32 %v3979_v63, %v3977_v54 }
 0x1ee   : > { %v953_v50 = vpack.c.bf16 %v4544_v35, %v4544_v35 }
 0x1f0   : > { %1179 = vmatmul.mubr.bf16.vlgmr.msra.gmra.mrb[4].mxu0 %v953_v50  ;;  %1220 = vmatmul.mubr.bf16.vlgmr.msra.gmra.mrb[36].mxu1 %v953_v50 }
 0x1f1   : > { %1455 = vmatpush1.bf16.msra.mxu0 %v4284_v6  ;;  %1496 = vmatpush1.bf16.msra.mxu1 %v4409_v2 }
 0x1f2   : > { %1456 = vmatprep.subr.bf16.mxu0 %v4286_v7  ;;  %1497 = vmatprep.subr.bf16.mxu1 %v4411_v3 }
 0x1f3   : > { %1486 = vmatprep.mubr.bf16.mxu0 %v4991_v62  ;;  %1527 = vmatprep.mubr.bf16.mxu1 %v4991_v62 }
 0x1f5   : > { %1457 = vmatpush1.bf16.msra.mxu0 %v4290_v10  ;;  %1498 = vmatpush1.bf16.msra.mxu1 %v4415_v4 }
 0x1f6   : > { %1458 = vmatprep.subr.bf16.mxu0 %v4293_v12  ;;  %1499 = vmatprep.subr.bf16.mxu1 %v4419_v5 }
 0x1f9   : > { %1459 = vmatpush1.bf16.msra.mxu0 %v4302_v16  ;;  %1500 = vmatpush1.bf16.msra.mxu1 %v4422_v8 }
 0x1fa   : > { %1460 = vmatprep.subr.bf16.mxu0 %v4311_v19  ;;  %1501 = vmatprep.subr.bf16.mxu1 %v4425_v9 }
 0x1fd   : > { %1461 = vmatpush1.bf16.msra.mxu0 %v4316_v21  ;;  %1502 = vmatpush1.bf16.msra.mxu1 %v4429_v11 }
 0x1fe   : > { %1462 = vmatprep.subr.bf16.mxu0 %v4323_v23  ;;  %1503 = vmatprep.subr.bf16.mxu1 %v4433_v13 }
 0x201   : > { %1463 = vmatpush1.bf16.msra.mxu0 %v4329_v25  ;;  %1504 = vmatpush1.bf16.msra.mxu1 %v4436_v14 }
 0x202   : > { %1464 = vmatprep.subr.bf16.mxu0 %v4331_v26  ;;  %1505 = vmatprep.subr.bf16.mxu1 %v4439_v15 }
 0x205   : > { %1465 = vmatpush1.bf16.msra.mxu0 %v4340_v29  ;;  %1506 = vmatpush1.bf16.msra.mxu1 %v4443_v17 }
 0x206   : > { %1466 = vmatprep.subr.bf16.mxu0 %v4342_v30  ;;  %1507 = vmatprep.subr.bf16.mxu1 %v4447_v18 }
 0x209   : > { %1467 = vmatpush1.bf16.msra.mxu0 %v4346_v31  ;;  %1508 = vmatpush1.bf16.msra.mxu1 %v4450_v20 }
 0x20a   : > { %1468 = vmatprep.subr.bf16.mxu0 %v4348_v32  ;;  %1509 = vmatprep.subr.bf16.mxu1 %v4453_v22 }
 0x20d   : > { %1469 = vmatpush1.bf16.msra.mxu0 %v4352_v33  ;;  %1510 = vmatpush1.bf16.msra.mxu1 %v4457_v24 }
 0x20e   : > { %1803 = vmatprep.subr.bf16.mxu1 %v4402_v56 }
 0x2c3   : > { %v1180_v6 = vpop.f32.mrb[4].mxu0  ;;  %v1221_v7 = vpop.f32.mrb[36].mxu1 }
 0x2c4   : > { %v1228_v10 = vadd.f32 %v1180_v6, %v4485_v48  ;;  %v1230_v12 = vadd.f32 %v1221_v7, %v4513_v38  ;;  %v1182_v16 = vpop.f32.mrb[5].mxu0  ;;  %v1223_v19 = vpop.f32.mrb[37].mxu1 }
 0x2c5   : > { %v1229_v21 = vadd.f32 %v1182_v16, %v4487_v51  ;;  %v1231_v23 = vadd.f32 %v1223_v19, %v4515_v36  ;;  %v1184_v25 = vpop.f32.mrb[6].mxu0  ;;  %v1225_v26 = vpop.f32.mrb[38].mxu1 }
 0x2c6   : > { %v3527_v29 = vmul.f32 -1.442695, %v1228_v10  ;;  %v1185_v30 = vpop.f32.mrb[7].mxu0  ;;  %v1226_v31 = vpop.f32.mrb[39].mxu1  ;;  %v3529_v33 = vmul.f32 -1.442695, %v1230_v12 }
 0x2c7   : > { %v3528_v32 = vmul.f32 -1.442695, %v1229_v21 }
 0x2c8   : > { %3980 = vpow2.f32 %v3527_v29 }
 0x2c9   : > { %3982 = vpow2.f32 %v3528_v32 }
 0x2ca   : > { %3984 = vtanh.f32 %v1231_v23 }
 0x2cb   : > { %3986 = vpow2.f32 %v3529_v33 }
 0x2d2   : > { %v3981_v56 = vpop.eup %3980 }
 0x2d3   : > { %v1241_v28 = vadd.f32 1.0, %v3981_v56  ;;  %v3983_v48 = vpop.eup %3982 }
 0x2d4   : > { %v1242_v38 = vadd.f32 1.0, %v3983_v48  ;;  %v3985_v51 = vpop.eup %3984 }
 0x2d5   : > { %3988 = vrcp.f32 %v1241_v28  ;;  %v3987_v0 = vpop.eup %3986 }
 0x2d6   : > { %3990 = vrcp.f32 %v1242_v38  ;;  %v1243_v61 = vadd.f32 1.0, %v3987_v0 }
 0x2d8   : > { %3992 = vrcp.f32 %v1243_v61  ;;  %v4694_v61 = vld [vmem:[#allocation4 + $0x8] ss:$16 sps:$4 sm:$0xff]  }
 0x2df   : > { %v3989_v36 = vpop.eup %3988 }
 0x2e0   : > { %v1252_v27 = vmul.f32 %v3989_v36, %v3985_v51  ;;  %v3991_v34 = vpop.eup %3990 }
 0x2e1   : > { %v1251_v52 = vmul.f32 %v3991_v34, %v4541_v47  ;;  %v4657_v47 = vld [vmem:[#allocation4 + $0xe0] ss:$16 sps:$4 sm:$0xff]   ;;  %v4692_v34 = vld [vmem:[#allocation4 + $0xc] ss:$16 sps:$4 sm:$0xff]  }
 0x2e2   : > { %v3993_v37 = vpop.eup %3992 }
 0x2e3   : > { %v4586_v43 = vadd.f32 %v1252_v27, %v1251_v52  ;;  %v4698_v52 = vld [vmem:[#allocation4 + $0x2c] ss:$16 sps:$4 sm:$0xff]  }
 0x2e5   : > { %3994 = vtanh.f32 %v4586_v43 }
 0x2e6   : > { %3996 = vtanh.f32 %v4544_v35 }
 0x2ef   : > { %v3995_v42 = vpop.eup %3994 }
 0x2f0   : > { %v1255_v39 = vmul.f32 %v3995_v42, %v3993_v37  ;;  %v4596_v49 = vpop.eup %3996  ;;  %v4704_v37 = vld [vmem:[#allocation4 + $0x4c] ss:$16 sps:$4 sm:$0xff]   ;;  %v4706_v42 = vld [vmem:[#allocation4 + $0x48] ss:$16 sps:$4 sm:$0xff]  }
 0x2f2   : > { %v1261_v57 = vpack.c.bf16 %v1255_v39, %v1255_v39  ;;  %3998 = vtanh.f32 %v1255_v39  ;;  %v4710_v39 = vld [vmem:[#allocation4 + $0x6c] ss:$16 sps:$4 sm:$0xff]  }
 0x2f4   : > { %1487 = vmatmul.mubr.bf16.vlgmr.msra.gmra.mrb[8].mxu0 %v1261_v57  ;;  %1528 = vmatmul.mubr.bf16.vlgmr.msra.gmra.mrb[40].mxu1 %v1261_v57  ;;  %v4712_v57 = vld [vmem:[#allocation4 + $0x68] ss:$16 sps:$4 sm:$0xff]  }
 0x2f5   : > { %1804 = vmatpush1.bf16.msra.mxu1 %v4409_v2  ;;  %1794 = vmatprep.mubr.bf16.mxu0 %v4991_v62  ;;  %v4613_v2 = vld [vmem:[#allocation4 + $0x4] ss:$16 sps:$4 sm:$0xff]  }
 0x2f6   : > { %1805 = vmatprep.subr.bf16.mxu1 %v4411_v3  ;;  %1835 = vmatprep.mubr.bf16.mxu1 %v4991_v62  ;;  %v4615_v3 = vld [vmem:[#allocation4] ss:$16 sps:$4 sm:$0xff]  }
 0x2f7   : > { %1762 = vmatprep.subr.bf16.mxu0 %v4613_v2 }
 0x2f8   : > { %1763 = vmatpush1.bf16.msra.mxu0 %v4615_v3 }
 0x2f9   : > { %1806 = vmatpush1.bf16.msra.mxu1 %v4415_v4  ;;  %v4619_v4 = vld [vmem:[#allocation4 + $0x24] ss:$16 sps:$4 sm:$0xff]  }
 0x2fa   : > { %1807 = vmatprep.subr.bf16.mxu1 %v4419_v5  ;;  %v4621_v5 = vld [vmem:[#allocation4 + $0x20] ss:$16 sps:$4 sm:$0xff]   ;;  %1764 = vmatprep.subr.bf16.mxu0 %v4619_v4 }
 0x2fc   : > { %v4598_v1 = vpop.eup %3998  ;;  %1765 = vmatpush1.bf16.msra.mxu0 %v4621_v5 }
 0x2fd   : > { %1808 = vmatpush1.bf16.msra.mxu1 %v4422_v8  ;;  %v3121_v59 = vpack.c.bf16 %v4598_v1, %v4596_v49  ;;  %v4625_v8 = vld [vmem:[#allocation4 + $0x44] ss:$16 sps:$4 sm:$0xff]   ;;  %v3961_v49 = vld [vmem:[%s4963_s4 + $0x28] sm:$0xff]  }
 0x2fe   : > { %1809 = vmatprep.subr.bf16.mxu1 %v4425_v9  ;;  %v4627_v9 = vld [vmem:[#allocation4 + $0x40] ss:$16 sps:$4 sm:$0xff]   ;;  %1766 = vmatprep.subr.bf16.mxu0 %v4625_v8 }
 0x2ff   : > { %v3962_v1 = vld [vmem:[%s4963_s4 + $0x30] sm:$0xff]  }
 0x300   : > { %1767 = vmatpush1.bf16.msra.mxu0 %v4627_v9 }
 0x301   : > { %1810 = vmatpush1.bf16.msra.mxu1 %v4429_v11  ;;  %v4631_v11 = vld [vmem:[#allocation4 + $0x64] ss:$16 sps:$4 sm:$0xff]  }
 0x302   : > { %1811 = vmatprep.subr.bf16.mxu1 %v4433_v13  ;;  %v4633_v13 = vld [vmem:[#allocation4 + $0x60] ss:$16 sps:$4 sm:$0xff]   ;;  %1768 = vmatprep.subr.bf16.mxu0 %v4631_v11 }
 0x304   : > { %1769 = vmatpush1.bf16.msra.mxu0 %v4633_v13 }
 0x305   : > { %1812 = vmatpush1.bf16.msra.mxu1 %v4436_v14  ;;  %v4637_v14 = vld [vmem:[#allocation4 + $0x84] ss:$16 sps:$4 sm:$0xff]  }
 0x306   : > { %1813 = vmatprep.subr.bf16.mxu1 %v4439_v15  ;;  %v4639_v15 = vld [vmem:[#allocation4 + $0x80] ss:$16 sps:$4 sm:$0xff]   ;;  %1770 = vmatprep.subr.bf16.mxu0 %v4637_v14 }
 0x308   : > { %1771 = vmatpush1.bf16.msra.mxu0 %v4639_v15 }
 0x309   : > { %1814 = vmatpush1.bf16.msra.mxu1 %v4443_v17  ;;  %v4643_v17 = vld [vmem:[#allocation4 + $0xa0] ss:$16 sps:$4 sm:$0xff]  }
 0x30a   : > { %1815 = vmatprep.subr.bf16.mxu1 %v4447_v18  ;;  %v4645_v18 = vld [vmem:[#allocation4 + $0xa4] ss:$16 sps:$4 sm:$0xff]  }
 0x30b   : > { %1772 = vmatprep.subr.bf16.mxu0 %v4645_v18 }
 0x30c   : > { %1773 = vmatpush1.bf16.msra.mxu0 %v4643_v17 }
 0x30d   : > { %1816 = vmatpush1.bf16.msra.mxu1 %v4450_v20  ;;  %v4647_v20 = vld [vmem:[#allocation4 + $0xc4] ss:$16 sps:$4 sm:$0xff]  }
 0x30e   : > { %1817 = vmatprep.subr.bf16.mxu1 %v4453_v22  ;;  %v4651_v22 = vld [vmem:[#allocation4 + $0xc0] ss:$16 sps:$4 sm:$0xff]   ;;  %1774 = vmatprep.subr.bf16.mxu0 %v4647_v20 }
 0x310   : > { %1775 = vmatpush1.bf16.msra.mxu0 %v4651_v22 }
 0x311   : > { %1818 = vmatpush1.bf16.msra.mxu1 %v4457_v24  ;;  %v4654_v24 = vld [vmem:[#allocation4 + $0xe4] ss:$16 sps:$4 sm:$0xff]  }
 0x312   : > { %1776 = vmatprep.subr.bf16.mxu0 %v4654_v24  ;;  %2111 = vmatprep.subr.bf16.mxu1 %v4692_v34 }
 0x314   : > { %1777 = vmatpush1.bf16.msra.mxu0 %v4657_v47 }
 0x315   : > { %2070 = vmatprep.subr.bf16.mxu0 %v4613_v2 }
 0x3c7   : > { %v1488_v54 = vpop.f32.mrb[8].mxu0  ;;  %v1529_v63 = vpop.f32.mrb[40].mxu1 }
 0x3c8   : > { %v1536_v35 = vadd.f32 %v1488_v54, %v4489_v53  ;;  %v1538_v50 = vadd.f32 %v1529_v63, %v4517_v45  ;;  %v1490_v6 = vpop.f32.mrb[9].mxu0  ;;  %v1531_v7 = vpop.f32.mrb[41].mxu1  ;;  %v4716_v54 = vld [vmem:[#allocation4 + $0x8c] ss:$16 sps:$4 sm:$0xff]   ;;  %v4718_v63 = vld [vmem:[#allocation4 + $0x88] ss:$16 sps:$4 sm:$0xff]  }
 0x3c9   : > { %v1537_v10 = vadd.f32 %v1490_v6, %v4491_v55  ;;  %v1539_v12 = vadd.f32 %v1531_v7, %v4519_v41  ;;  %v1492_v16 = vpop.f32.mrb[10].mxu0  ;;  %v1533_v19 = vpop.f32.mrb[42].mxu1  ;;  %v4726_v6 = vld [vmem:[#allocation4 + $0xcc] ss:$16 sps:$4 sm:$0xff]   ;;  %v4730_v7 = vld [vmem:[#allocation4 + $0xc8] ss:$16 sps:$4 sm:$0xff]  }
 0x3ca   : > { %v3562_v21 = vmul.f32 -1.442695, %v1536_v35  ;;  %v1493_v23 = vpop.f32.mrb[11].mxu0  ;;  %v1534_v25 = vpop.f32.mrb[43].mxu1  ;;  %v3564_v29 = vmul.f32 -1.442695, %v1538_v50 }
 0x3cb   : > { %v3563_v26 = vmul.f32 -1.442695, %v1537_v10  ;;  %v4722_v35 = vld [vmem:[#allocation4 + $0xa8] ss:$16 sps:$4 sm:$0xff]   ;;  %v4724_v50 = vld [vmem:[#allocation4 + $0xac] ss:$16 sps:$4 sm:$0xff]  }
 0x3cc   : > { %4000 = vpow2.f32 %v3562_v21  ;;  %v4733_v10 = vld [vmem:[#allocation4 + $0xec] ss:$16 sps:$4 sm:$0xff]  }
 0x3cd   : > { %4002 = vpow2.f32 %v3563_v26 }
 0x3ce   : > { %4004 = vtanh.f32 %v1539_v12  ;;  %v4736_v12 = vld [vmem:[#allocation4 + $0xe8] ss:$16 sps:$4 sm:$0xff]  }
 0x3cf   : > { %4006 = vpow2.f32 %v3564_v29 }
 0x3d6   : > { %v4001_v30 = vpop.eup %4000 }
 0x3d7   : > { %v1549_v31 = vadd.f32 1.0, %v4001_v30  ;;  %v4003_v53 = vpop.eup %4002 }
 0x3d8   : > { %v1550_v45 = vadd.f32 1.0, %v4003_v53  ;;  %v4005_v55 = vpop.eup %4004 }
 0x3d9   : > { %4008 = vrcp.f32 %v1549_v31  ;;  %v4007_v32 = vpop.eup %4006 }
 0x3da   : > { %4010 = vrcp.f32 %v1550_v45  ;;  %v1551_v28 = vadd.f32 1.0, %v4007_v32 }
 0x3dc   : > { %4012 = vrcp.f32 %v1551_v28 }
 0x3e3   : > { %v4009_v41 = vpop.eup %4008 }
 0x3e4   : > { %v1560_v33 = vmul.f32 %v4009_v41, %v4005_v55  ;;  %v4011_v56 = vpop.eup %4010 }
 0x3e5   : > { %v1559_v48 = vmul.f32 %v4011_v56, %v4586_v43  ;;  %v4700_v43 = vld [vmem:[#allocation4 + $0x28] ss:$16 sps:$4 sm:$0xff]  }
 0x3e6   : > { %v4013_v51 = vpop.eup %4012 }
 0x3e7   : > { %v4667_v38 = vadd.f32 %v1560_v33, %v1559_v48 }
 0x3e9   : > { %4014 = vtanh.f32 %v4667_v38 }
 0x3f3   : > { %v4015_v0 = vpop.eup %4014 }
 0x3f4   : > { %v4670_v36 = vmul.f32 %v4015_v0, %v4013_v51 }
 0x3f6   : > { %v1569_v27 = vpack.c.bf16 %v4670_v36, %v4670_v36 }
 0x3f8   : > { %1795 = vmatmul.mubr.bf16.vlgmr.msra.gmra.mrb[12].mxu0 %v1569_v27  ;;  %1836 = vmatmul.mubr.bf16.vlgmr.msra.gmra.mrb[44].mxu1 %v1569_v27 }
 0x3f9   : > { %2071 = vmatpush1.bf16.msra.mxu0 %v4615_v3  ;;  %2102 = vmatprep.mubr.bf16.mxu0 %v4991_v62 }
 0x3fa   : > { %2072 = vmatprep.subr.bf16.mxu0 %v4619_v4  ;;  %2143 = vmatprep.mubr.bf16.mxu1 %v4991_v62 }
 0x3fb   : > { %2112 = vmatpush1.bf16.msra.mxu1 %v4694_v61 }
 0x3fc   : > { %2113 = vmatprep.subr.bf16.mxu1 %v4698_v52 }
 0x3fd   : > { %2073 = vmatpush1.bf16.msra.mxu0 %v4621_v5 }
 0x3fe   : > { %2074 = vmatprep.subr.bf16.mxu0 %v4625_v8 }
 0x3ff   : > { %2114 = vmatpush1.bf16.msra.mxu1 %v4700_v43 }
 0x400   : > { %2115 = vmatprep.subr.bf16.mxu1 %v4704_v37 }
 0x401   : > { %2075 = vmatpush1.bf16.msra.mxu0 %v4627_v9 }
 0x402   : > { %2076 = vmatprep.subr.bf16.mxu0 %v4631_v11 }
 0x403   : > { %2116 = vmatpush1.bf16.msra.mxu1 %v4706_v42 }
 0x404   : > { %2117 = vmatprep.subr.bf16.mxu1 %v4710_v39 }
 0x405   : > { %2077 = vmatpush1.bf16.msra.mxu0 %v4633_v13 }
 0x406   : > { %2078 = vmatprep.subr.bf16.mxu0 %v4637_v14 }
 0x407   : > { %2118 = vmatpush1.bf16.msra.mxu1 %v4712_v57 }
 0x408   : > { %2119 = vmatprep.subr.bf16.mxu1 %v4716_v54 }
 0x409   : > { %2079 = vmatpush1.bf16.msra.mxu0 %v4639_v15 }
 0x40a   : > { %2080 = vmatprep.subr.bf16.mxu0 %v4645_v18 }
 0x40b   : > { %2120 = vmatpush1.bf16.msra.mxu1 %v4718_v63 }
 0x40c   : > { %2121 = vmatprep.subr.bf16.mxu1 %v4724_v50 }
 0x40d   : > { %2081 = vmatpush1.bf16.msra.mxu0 %v4643_v17 }
 0x40e   : > { %2082 = vmatprep.subr.bf16.mxu0 %v4647_v20 }
 0x40f   : > { %2122 = vmatpush1.bf16.msra.mxu1 %v4722_v35 }
 0x410   : > { %2123 = vmatprep.subr.bf16.mxu1 %v4726_v6 }
 0x411   : > { %2083 = vmatpush1.bf16.msra.mxu0 %v4651_v22 }
 0x412   : > { %2084 = vmatprep.subr.bf16.mxu0 %v4654_v24 }
 0x413   : > { %2124 = vmatpush1.bf16.msra.mxu1 %v4730_v7 }
 0x414   : > { %2125 = vmatprep.subr.bf16.mxu1 %v4733_v10 }
 0x415   : > { %2085 = vmatpush1.bf16.msra.mxu0 %v4657_v47 }
 0x416   : > { %2378 = vmatprep.subr.bf16.mxu0 %v4613_v2 }
 0x417   : > { %2126 = vmatpush1.bf16.msra.mxu1 %v4736_v12 }
 0x418   : > { %2419 = vmatprep.subr.bf16.mxu1 %v4692_v34 }
 0x4cb   : > { %v1796_v16 = vpop.f32.mrb[12].mxu0  ;;  %v1837_v19 = vpop.f32.mrb[44].mxu1 }
 0x4cc   : > { %v1844_v21 = vadd.f32 %v1796_v16, %v4493_v58  ;;  %v1846_v23 = vadd.f32 %v1837_v19, %v4521_v46  ;;  %v1798_v25 = vpop.f32.mrb[13].mxu0  ;;  %v1839_v26 = vpop.f32.mrb[45].mxu1 }
 0x4cd   : > { %v1845_v29 = vadd.f32 %v1798_v25, %v4495_v60  ;;  %v1847_v30 = vadd.f32 %v1839_v26, %v4523_v44  ;;  %v1800_v31 = vpop.f32.mrb[14].mxu0  ;;  %v1841_v53 = vpop.f32.mrb[46].mxu1 }
 0x4ce   : > { %v3597_v45 = vmul.f32 -1.442695, %v1844_v21  ;;  %v1801_v55 = vpop.f32.mrb[15].mxu0  ;;  %v1842_v32 = vpop.f32.mrb[47].mxu1  ;;  %v3599_v33 = vmul.f32 -1.442695, %v1846_v23 }
 0x4cf   : > { %v3598_v41 = vmul.f32 -1.442695, %v1845_v29  ;;  %v4992_v53 = vld [vmem:[#allocation7_spill] sm:$0xff] }
 0x4d0   : > { %4016 = vpow2.f32 %v3597_v45  ;;  %v4993_v55 = vld [vmem:[#allocation15_spill] sm:$0xff] }
 0x4d1   : > { %4018 = vpow2.f32 %v3598_v41 }
 0x4d2   : > { %4020 = vtanh.f32 %v1847_v30 }
 0x4d3   : > { %4022 = vpow2.f32 %v3599_v33 }
 0x4da   : > { %v4017_v56 = vpop.eup %4016 }
 0x4db   : > { %v1857_v28 = vadd.f32 1.0, %v4017_v56  ;;  %v4019_v58 = vpop.eup %4018  ;;  %v4994_v56 = vld [vmem:[#allocation8_spill] sm:$0xff] }
 0x4dc   : > { %v1858_v46 = vadd.f32 1.0, %v4019_v58  ;;  %v4021_v60 = vpop.eup %4020  ;;  %v4995_v58 = vld [vmem:[#allocation16_spill] sm:$0xff] }
 0x4dd   : > { %4024 = vrcp.f32 %v1857_v28  ;;  %v4023_v48 = vpop.eup %4022 }
 0x4de   : > { %4026 = vrcp.f32 %v1858_v46  ;;  %v1859_v27 = vadd.f32 1.0, %v4023_v48 }
 0x4e0   : > { %4028 = vrcp.f32 %v1859_v27 }
 0x4e7   : > { %v4025_v44 = vpop.eup %4024 }
 0x4e8   : > { %v1868_v51 = vmul.f32 %v4025_v44, %v4021_v60  ;;  %v4027_v0 = vpop.eup %4026 }
 0x4e9   : > { %v1867_v16 = vmul.f32 %v4027_v0, %v4667_v38 }
 0x4ea   : > { %v4029_v21 = vpop.eup %4028 }
 0x4eb   : > { %v4746_v19 = vadd.f32 %v1868_v51, %v1867_v16 }
 0x4ed   : > { %4030 = vtanh.f32 %v4746_v19 }
 0x4ee   : > { %4032 = vtanh.f32 %v4670_v36 }
 0x4f7   : > { %v4031_v23 = vpop.eup %4030 }
 0x4f8   : > { %v1871_v25 = vmul.f32 %v4031_v23, %v4029_v21  ;;  %v4760_v38 = vpop.eup %4032 }
 0x4fa   : > { %v1877_v26 = vpack.c.bf16 %v1871_v25, %v1871_v25  ;;  %4034 = vtanh.f32 %v1871_v25 }
 0x4fc   : > { %2103 = vmatmul.mubr.bf16.vlgmr.msra.gmra.mrb[16].mxu0 %v1877_v26  ;;  %2144 = vmatmul.mubr.bf16.vlgmr.msra.gmra.mrb[48].mxu1 %v1877_v26 }
 0x4fd   : > { %2379 = vmatpush1.bf16.msra.mxu0 %v4615_v3  ;;  %2420 = vmatpush1.bf16.msra.mxu1 %v4694_v61 }
 0x4fe   : > { %2380 = vmatprep.subr.bf16.mxu0 %v4619_v4  ;;  %2421 = vmatprep.subr.bf16.mxu1 %v4698_v52 }
 0x4ff   : > { %2410 = vmatprep.mubr.bf16.mxu0 %v4991_v62  ;;  %2451 = vmatprep.mubr.bf16.mxu1 %v4991_v62 }
 0x501   : > { %2381 = vmatpush1.bf16.msra.mxu0 %v4621_v5  ;;  %2422 = vmatpush1.bf16.msra.mxu1 %v4700_v43 }
 0x502   : > { %2382 = vmatprep.subr.bf16.mxu0 %v4625_v8  ;;  %2423 = vmatprep.subr.bf16.mxu1 %v4704_v37 }
 0x504   : > { %v4762_v36 = vpop.eup %4034 }
 0x505   : > { %2383 = vmatpush1.bf16.msra.mxu0 %v4627_v9  ;;  %2424 = vmatpush1.bf16.msra.mxu1 %v4706_v42  ;;  %v3122_v29 = vpack.c.bf16 %v4762_v36, %v4760_v38 }
 0x506   : > { %2384 = vmatprep.subr.bf16.mxu0 %v4631_v11  ;;  %2425 = vmatprep.subr.bf16.mxu1 %v4710_v39 }
 0x509   : > { %2385 = vmatpush1.bf16.msra.mxu0 %v4633_v13  ;;  %2426 = vmatpush1.bf16.msra.mxu1 %v4712_v57 }
 0x50a   : > { %2386 = vmatprep.subr.bf16.mxu0 %v4637_v14  ;;  %2427 = vmatprep.subr.bf16.mxu1 %v4716_v54 }
 0x50d   : > { %2387 = vmatpush1.bf16.msra.mxu0 %v4639_v15  ;;  %2428 = vmatpush1.bf16.msra.mxu1 %v4718_v63 }
 0x50e   : > { %2388 = vmatprep.subr.bf16.mxu0 %v4645_v18  ;;  %2429 = vmatprep.subr.bf16.mxu1 %v4724_v50 }
 0x511   : > { %2389 = vmatpush1.bf16.msra.mxu0 %v4643_v17  ;;  %2430 = vmatpush1.bf16.msra.mxu1 %v4722_v35 }
 0x512   : > { %2390 = vmatprep.subr.bf16.mxu0 %v4647_v20  ;;  %2431 = vmatprep.subr.bf16.mxu1 %v4726_v6 }
 0x515   : > { %2391 = vmatpush1.bf16.msra.mxu0 %v4651_v22  ;;  %2432 = vmatpush1.bf16.msra.mxu1 %v4730_v7 }
 0x516   : > { %2392 = vmatprep.subr.bf16.mxu0 %v4654_v24  ;;  %2433 = vmatprep.subr.bf16.mxu1 %v4733_v10 }
 0x519   : > { %2393 = vmatpush1.bf16.msra.mxu0 %v4657_v47  ;;  %2434 = vmatpush1.bf16.msra.mxu1 %v4736_v12 }
 0x51a   : > { %2686 = vmatprep.subr.bf16.mxu0 %v4613_v2  ;;  %2727 = vmatprep.subr.bf16.mxu1 %v4692_v34 }
 0x5cf   : > { %v2104_v30 = vpop.f32.mrb[16].mxu0  ;;  %v2145_v31 = vpop.f32.mrb[48].mxu1 }
 0x5d0   : > { %v2152_v45 = vadd.f32 %v2104_v30, %v4992_v53  ;;  %v2154_v32 = vadd.f32 %v2145_v31, %v4993_v55  ;;  %v2106_v41 = vpop.f32.mrb[17].mxu0  ;;  %v2147_v33 = vpop.f32.mrb[49].mxu1 }
 0x5d1   : > { %v2153_v28 = vadd.f32 %v2106_v41, %v4994_v56  ;;  %v2155_v46 = vadd.f32 %v2147_v33, %v4995_v58  ;;  %v2108_v60 = vpop.f32.mrb[18].mxu0  ;;  %v2149_v48 = vpop.f32.mrb[50].mxu1 }
 0x5d2   : > { %v3632_v44 = vmul.f32 -1.442695, %v2152_v45  ;;  %v2109_v51 = vpop.f32.mrb[19].mxu0  ;;  %v2150_v0 = vpop.f32.mrb[51].mxu1  ;;  %v3634_v27 = vmul.f32 -1.442695, %v2154_v32 }
 0x5d3   : > { %v3633_v2 = vmul.f32 -1.442695, %v2153_v28 }
 0x5d4   : > { %4036 = vpow2.f32 %v3632_v44 }
 0x5d5   : > { %4038 = vpow2.f32 %v3633_v2 }
 0x5d6   : > { %4040 = vtanh.f32 %v2155_v46 }
 0x5d7   : > { %4042 = vpow2.f32 %v3634_v27 }
 0x5de   : > { %v4037_v16 = vpop.eup %4036 }
 0x5df   : > { %v2165_v21 = vadd.f32 1.0, %v4037_v16  ;;  %v4039_v23 = vpop.eup %4038 }
 0x5e0   : > { %v2166_v25 = vadd.f32 1.0, %v4039_v23  ;;  %v4041_v26 = vpop.eup %4040 }
 0x5e1   : > { %4044 = vrcp.f32 %v2165_v21  ;;  %v4043_v30 = vpop.eup %4042 }
 0x5e2   : > { %4046 = vrcp.f32 %v2166_v25  ;;  %v2167_v45 = vadd.f32 1.0, %v4043_v30 }
 0x5e4   : > { %4048 = vrcp.f32 %v2167_v45 }
 0x5eb   : > { %v4045_v31 = vpop.eup %4044 }
 0x5ec   : > { %v2176_v53 = vmul.f32 %v4045_v31, %v4041_v26  ;;  %v4047_v55 = vpop.eup %4046 }
 0x5ed   : > { %v2175_v41 = vmul.f32 %v4047_v55, %v4746_v19 }
 0x5ee   : > { %v4049_v32 = vpop.eup %4048 }
 0x5ef   : > { %v4795_v33 = vadd.f32 %v2176_v53, %v2175_v41 }
 0x5f1   : > { %4050 = vtanh.f32 %v4795_v33 }
 0x5fb   : > { %v4051_v56 = vpop.eup %4050 }
 0x5fc   : > { %v4798_v28 = vmul.f32 %v4051_v56, %v4049_v32  ;;  %v3956_v56 = vld [vmem:[%s4963_s4] sm:$0xff]  }
 0x5fe   : > { %v2185_v58 = vpack.c.bf16 %v4798_v28, %v4798_v28 }
 0x600   : > { %2411 = vmatmul.mubr.bf16.vlgmr.msra.gmra.mrb[20].mxu0 %v2185_v58  ;;  %2452 = vmatmul.mubr.bf16.vlgmr.msra.gmra.mrb[52].mxu1 %v2185_v58 }
 0x601   : > { %2687 = vmatpush1.bf16.msra.mxu0 %v4615_v3  ;;  %2728 = vmatpush1.bf16.msra.mxu1 %v4694_v61 }
 0x602   : > { %2688 = vmatprep.subr.bf16.mxu0 %v4619_v4  ;;  %2729 = vmatprep.subr.bf16.mxu1 %v4698_v52 }
 0x603   : > { %2718 = vmatprep.mubr.bf16.mxu0 %v4991_v62  ;;  %2759 = vmatprep.mubr.bf16.mxu1 %v4991_v62 }
 0x605   : > { %2689 = vmatpush1.bf16.msra.mxu0 %v4621_v5  ;;  %2730 = vmatpush1.bf16.msra.mxu1 %v4700_v43  ;;  %v4996_v5 = vld [vmem:[#allocation9_spill] sm:$0xff] }
 0x606   : > { %2690 = vmatprep.subr.bf16.mxu0 %v4625_v8  ;;  %2731 = vmatprep.subr.bf16.mxu1 %v4704_v37 }
 0x609   : > { %2691 = vmatpush1.bf16.msra.mxu0 %v4627_v9  ;;  %2732 = vmatpush1.bf16.msra.mxu1 %v4706_v42  ;;  %v4997_v9 = vld [vmem:[#allocation17_spill] sm:$0xff] }
 0x60a   : > { %2692 = vmatprep.subr.bf16.mxu0 %v4631_v11  ;;  %2733 = vmatprep.subr.bf16.mxu1 %v4710_v39 }
 0x60d   : > { %2693 = vmatpush1.bf16.msra.mxu0 %v4633_v13  ;;  %2734 = vmatpush1.bf16.msra.mxu1 %v4712_v57 }
 0x60e   : > { %2694 = vmatprep.subr.bf16.mxu0 %v4637_v14  ;;  %2735 = vmatprep.subr.bf16.mxu1 %v4716_v54 }
 0x611   : > { %2695 = vmatpush1.bf16.msra.mxu0 %v4639_v15  ;;  %2736 = vmatpush1.bf16.msra.mxu1 %v4718_v63  ;;  %v4998_v15 = vld [vmem:[#allocation10_spill] sm:$0xff] }
 0x612   : > { %2696 = vmatprep.subr.bf16.mxu0 %v4645_v18  ;;  %2737 = vmatprep.subr.bf16.mxu1 %v4724_v50  ;;  %v4999_v18 = vld [vmem:[#allocation18_spill] sm:$0xff] }
 0x615   : > { %2697 = vmatpush1.bf16.msra.mxu0 %v4643_v17  ;;  %2738 = vmatpush1.bf16.msra.mxu1 %v4722_v35 }
 0x616   : > { %2698 = vmatprep.subr.bf16.mxu0 %v4647_v20  ;;  %2739 = vmatprep.subr.bf16.mxu1 %v4726_v6 }
 0x619   : > { %2699 = vmatpush1.bf16.msra.mxu0 %v4651_v22  ;;  %2740 = vmatpush1.bf16.msra.mxu1 %v4730_v7 }
 0x61a   : > { %2700 = vmatprep.subr.bf16.mxu0 %v4654_v24  ;;  %2741 = vmatprep.subr.bf16.mxu1 %v4733_v10 }
 0x61d   : > { %2701 = vmatpush1.bf16.msra.mxu0 %v4657_v47  ;;  %2742 = vmatpush1.bf16.msra.mxu1 %v4736_v12 }
 0x61e   : > { %3035 = vmatprep.subr.bf16.mxu1 %v4692_v34 }
 0x6d3   : > { %v2412_v3 = vpop.f32.mrb[20].mxu0  ;;  %v2453_v4 = vpop.f32.mrb[52].mxu1 }
 0x6d4   : > { %v2460_v8 = vadd.f32 %v2412_v3, %v4996_v5  ;;  %v2462_v11 = vadd.f32 %v2453_v4, %v4997_v9  ;;  %v2414_v13 = vpop.f32.mrb[21].mxu0  ;;  %v2455_v14 = vpop.f32.mrb[53].mxu1  ;;  %v5000_v3 = vld [vmem:[#allocation11_spill] sm:$0xff] }
 0x6d5   : > { %v2461_v17 = vadd.f32 %v2414_v13, %v4998_v15  ;;  %v2463_v20 = vadd.f32 %v2455_v14, %v4999_v18  ;;  %v2416_v22 = vpop.f32.mrb[22].mxu0  ;;  %v2457_v24 = vpop.f32.mrb[54].mxu1  ;;  %v5001_v5 = vld [vmem:[#allocation19_spill] sm:$0xff]  ;;  %v5002_v13 = vld [vmem:[#allocation12_spill] sm:$0xff] }
 0x6d6   : > { %v3667_v19 = vmul.f32 -1.442695, %v2460_v8  ;;  %v2417_v47 = vpop.f32.mrb[23].mxu0  ;;  %v2458_v46 = vpop.f32.mrb[55].mxu1  ;;  %v3669_v34 = vmul.f32 -1.442695, %v2462_v11 }
 0x6d7   : > { %v3668_v60 = vmul.f32 -1.442695, %v2461_v17  ;;  %v5003_v15 = vld [vmem:[#allocation20_spill] sm:$0xff] }
 0x6d8   : > { %4052 = vpow2.f32 %v3667_v19 }
 0x6d9   : > { %4054 = vpow2.f32 %v3668_v60 }
 0x6da   : > { %4056 = vtanh.f32 %v2463_v20 }
 0x6db   : > { %4058 = vpow2.f32 %v3669_v34 }
 0x6e2   : > { %v4053_v48 = vpop.eup %4052 }
 0x6e3   : > { %v2473_v44 = vadd.f32 1.0, %v4053_v48  ;;  %v4055_v51 = vpop.eup %4054 }
 0x6e4   : > { %v2474_v0 = vadd.f32 1.0, %v4055_v51  ;;  %v4057_v2 = vpop.eup %4056 }
 0x6e5   : > { %4060 = vrcp.f32 %v2473_v44  ;;  %v4059_v27 = vpop.eup %4058 }
 0x6e6   : > { %4062 = vrcp.f32 %v2474_v0  ;;  %v2475_v25 = vadd.f32 1.0, %v4059_v27 }
 0x6e8   : > { %4064 = vrcp.f32 %v2475_v25 }
 0x6ef   : > { %v4061_v16 = vpop.eup %4060 }
 0x6f0   : > { %v2484_v21 = vmul.f32 %v4061_v16, %v4057_v2  ;;  %v4063_v23 = vpop.eup %4062 }
 0x6f1   : > { %v2483_v26 = vmul.f32 %v4063_v23, %v4795_v33 }
 0x6f2   : > { %v4065_v31 = vpop.eup %4064 }
 0x6f3   : > { %v4840_v30 = vadd.f32 %v2484_v21, %v2483_v26 }
 0x6f5   : > { %4066 = vtanh.f32 %v4840_v30 }
 0x6f6   : > { %4068 = vtanh.f32 %v4798_v28 }
 0x6ff   : > { %v4067_v53 = vpop.eup %4066 }
 0x700   : > { %v2487_v55 = vmul.f32 %v4067_v53, %v4065_v31  ;;  %v4850_v41 = vpop.eup %4068 }
 0x702   : > { %v2493_v45 = vpack.c.bf16 %v2487_v55, %v2487_v55  ;;  %4070 = vtanh.f32 %v2487_v55 }
 0x704   : > { %2719 = vmatmul.mubr.bf16.vlgmr.msra.gmra.mrb[24].mxu0 %v2493_v45  ;;  %2760 = vmatmul.mubr.bf16.vlgmr.msra.gmra.mrb[56].mxu1 %v2493_v45  ;;  %v3957_v45 = vld [vmem:[%s4963_s4 + $0x8] sm:$0xff]  }
 0x705   : > { %3036 = vmatpush1.bf16.msra.mxu1 %v4694_v61  ;;  %3026 = vmatprep.mubr.bf16.mxu0 %v4991_v62  ;;  %v3932_v61 = vld [vmem:[#allocation4] ss:$16 sps:$4 sm:$0xff]  }
 0x706   : > { %3037 = vmatprep.subr.bf16.mxu1 %v4698_v52  ;;  %3067 = vmatprep.mubr.bf16.mxu1 %v4991_v62  ;;  %v3934_v62 = vld [vmem:[#allocation4 + $0x4] ss:$16 sps:$4 sm:$0xff]  }
 0x707   : > { %2994 = vmatprep.subr.bf16.mxu0 %v3934_v62  ;;  %v3937_v52 = vld [vmem:[#allocation4 + $0x24] ss:$16 sps:$4 sm:$0xff]   ;;  %v3959_v62 = vld [vmem:[%s4963_s4 + $0x18] sm:$0xff]  }
 0x708   : > { %2995 = vmatpush1.bf16.msra.mxu0 %v3932_v61  ;;  %v3960_v61 = vld [vmem:[%s4963_s4 + $0x20] sm:$0xff]  }
 0x709   : > { %3038 = vmatpush1.bf16.msra.mxu1 %v4700_v43  ;;  %v3935_v43 = vld [vmem:[#allocation4 + $0x20] ss:$16 sps:$4 sm:$0xff]   ;;  %2996 = vmatprep.subr.bf16.mxu0 %v3937_v52 }
 0x70a   : > { %3039 = vmatprep.subr.bf16.mxu1 %v4704_v37  ;;  %v3940_v37 = vld [vmem:[#allocation4 + $0x44] ss:$16 sps:$4 sm:$0xff]  }
 0x70c   : > { %v4852_v33 = vpop.eup %4070  ;;  %2997 = vmatpush1.bf16.msra.mxu0 %v3935_v43 }
 0x70d   : > { %3040 = vmatpush1.bf16.msra.mxu1 %v4706_v42  ;;  %v3123_v32 = vpack.c.bf16 %v4852_v33, %v4850_v41  ;;  %v3938_v42 = vld [vmem:[#allocation4 + $0x40] ss:$16 sps:$4 sm:$0xff]   ;;  %2998 = vmatprep.subr.bf16.mxu0 %v3940_v37 }
 0x70e   : > { %3041 = vmatprep.subr.bf16.mxu1 %v4710_v39  ;;  %v3943_v39 = vld [vmem:[#allocation4 + $0x64] ss:$16 sps:$4 sm:$0xff]  }
 0x70f   : > { %v5004_v37 = vld [vmem:[#allocation13_spill] sm:$0xff] }
 0x710   : > { %2999 = vmatpush1.bf16.msra.mxu0 %v3938_v42 }
 0x711   : > { %3042 = vmatpush1.bf16.msra.mxu1 %v4712_v57  ;;  %v3941_v57 = vld [vmem:[#allocation4 + $0x60] ss:$16 sps:$4 sm:$0xff]   ;;  %3000 = vmatprep.subr.bf16.mxu0 %v3943_v39 }
 0x712   : > { %3043 = vmatprep.subr.bf16.mxu1 %v4716_v54  ;;  %v3946_v54 = vld [vmem:[#allocation4 + $0x84] ss:$16 sps:$4 sm:$0xff]  }
 0x713   : > { %v5005_v39 = vld [vmem:[#allocation21_spill] sm:$0xff] }
 0x714   : > { %3001 = vmatpush1.bf16.msra.mxu0 %v3941_v57 }
 0x715   : > { %3044 = vmatpush1.bf16.msra.mxu1 %v4718_v63  ;;  %v3944_v63 = vld [vmem:[#allocation4 + $0x80] ss:$16 sps:$4 sm:$0xff]   ;;  %3002 = vmatprep.subr.bf16.mxu0 %v3946_v54 }
 0x716   : > { %3045 = vmatprep.subr.bf16.mxu1 %v4724_v50  ;;  %v3949_v50 = vld [vmem:[#allocation4 + $0xa4] ss:$16 sps:$4 sm:$0xff]  }
 0x718   : > { %3003 = vmatpush1.bf16.msra.mxu0 %v3944_v63 }
 0x719   : > { %3046 = vmatpush1.bf16.msra.mxu1 %v4722_v35  ;;  %v3947_v35 = vld [vmem:[#allocation4 + $0xa0] ss:$16 sps:$4 sm:$0xff]   ;;  %3004 = vmatprep.subr.bf16.mxu0 %v3949_v50 }
 0x71a   : > { %3047 = vmatprep.subr.bf16.mxu1 %v4726_v6  ;;  %v3952_v6 = vld [vmem:[#allocation4 + $0xc4] ss:$16 sps:$4 sm:$0xff]  }
 0x71c   : > { %3005 = vmatpush1.bf16.msra.mxu0 %v3947_v35  ;;  %v5006_v35 = vld [vmem:[#allocation14_spill] sm:$0xff] }
 0x71d   : > { %3048 = vmatpush1.bf16.msra.mxu1 %v4730_v7  ;;  %v3950_v7 = vld [vmem:[#allocation4 + $0xc0] ss:$16 sps:$4 sm:$0xff]   ;;  %3006 = vmatprep.subr.bf16.mxu0 %v3952_v6 }
 0x71e   : > { %3049 = vmatprep.subr.bf16.mxu1 %v4733_v10  ;;  %v3955_v10 = vld [vmem:[#allocation4 + $0xe4] ss:$16 sps:$4 sm:$0xff]  }
 0x720   : > { %3007 = vmatpush1.bf16.msra.mxu0 %v3950_v7 }
 0x721   : > { %3050 = vmatpush1.bf16.msra.mxu1 %v4736_v12  ;;  %v3953_v12 = vld [vmem:[#allocation4 + $0xe0] ss:$16 sps:$4 sm:$0xff]   ;;  %3008 = vmatprep.subr.bf16.mxu0 %v3955_v10 }
 0x724   : > { %3009 = vmatpush1.bf16.msra.mxu0 %v3953_v12 }
 0x725   : > { %3763 = vmatprep.subr.bf16.mxu0 %v3956_v56 }
 0x7d7   : > { %v2720_v28 = vpop.f32.mrb[24].mxu0  ;;  %v2761_v58 = vpop.f32.mrb[56].mxu1 }
 0x7d8   : > { %v2768_v4 = vadd.f32 %v2720_v28, %v5000_v3  ;;  %v2770_v8 = vadd.f32 %v2761_v58, %v5001_v5  ;;  %v2722_v9 = vpop.f32.mrb[25].mxu0  ;;  %v2763_v11 = vpop.f32.mrb[57].mxu1 }
 0x7d9   : > { %v2769_v14 = vadd.f32 %v2722_v9, %v5002_v13  ;;  %v2771_v17 = vadd.f32 %v2763_v11, %v5003_v15  ;;  %v2724_v18 = vpop.f32.mrb[26].mxu0  ;;  %v2765_v20 = vpop.f32.mrb[58].mxu1  ;;  %v3740_v9 = vld [vmem:[%s4964_s5] ss:$0 sm:$0xff] }
 0x7da   : > { %v3702_v22 = vmul.f32 -1.442695, %v2768_v4  ;;  %v2725_v24 = vpop.f32.mrb[27].mxu0  ;;  %v2766_v19 = vpop.f32.mrb[59].mxu1  ;;  %v3704_v46 = vmul.f32 -1.442695, %v2770_v8 }
 0x7db   : > { %v3703_v47 = vmul.f32 -1.442695, %v2769_v14 }
 0x7dc   : > { %4072 = vpow2.f32 %v3702_v22 }
 0x7dd   : > { %4074 = vpow2.f32 %v3703_v47 }
 0x7de   : > { %4076 = vtanh.f32 %v2771_v17 }
 0x7df   : > { %4078 = vpow2.f32 %v3704_v46 }
 0x7e6   : > { %v4073_v60 = vpop.eup %4072 }
 0x7e7   : > { %v2781_v34 = vadd.f32 1.0, %v4073_v60  ;;  %v4075_v48 = vpop.eup %4074 }
 0x7e8   : > { %v2782_v44 = vadd.f32 1.0, %v4075_v48  ;;  %v4077_v51 = vpop.eup %4076 }
 0x7e9   : > { %4080 = vrcp.f32 %v2781_v34  ;;  %v4079_v0 = vpop.eup %4078 }
 0x7ea   : > { %4082 = vrcp.f32 %v2782_v44  ;;  %v2783_v21 = vadd.f32 1.0, %v4079_v0 }
 0x7ec   : > { %4084 = vrcp.f32 %v2783_v21 }
 0x7f3   : > { %v4081_v2 = vpop.eup %4080 }
 0x7f4   : > { %v2792_v27 = vmul.f32 %v4081_v2, %v4077_v51  ;;  %v4083_v16 = vpop.eup %4082 }
 0x7f5   : > { %v2791_v23 = vmul.f32 %v4083_v16, %v4840_v30  ;;  %v3958_v30 = vld [vmem:[%s4963_s4 + $0x10] sm:$0xff]  }
 0x7f6   : > { %v4085_v26 = vpop.eup %4084 }
 0x7f7   : > { %v4875_v25 = vadd.f32 %v2792_v27, %v2791_v23 }
 0x7f9   : > { %4086 = vtanh.f32 %v4875_v25 }
 0x803   : > { %v4087_v31 = vpop.eup %4086 }
 0x804   : > { %v4878_v53 = vmul.f32 %v4087_v31, %v4085_v26 }
 0x806   : > { %v2801_v55 = vpack.c.bf16 %v4878_v53, %v4878_v53 }
 0x808   : > { %3027 = vmatmul.mubr.bf16.vlgmr.msra.gmra.mrb[28].mxu0 %v2801_v55  ;;  %3068 = vmatmul.mubr.bf16.vlgmr.msra.gmra.mrb[60].mxu1 %v2801_v55 }
 0x809   : > { %3764 = vmatpush3.bf16.msra.mxu0 %v3956_v56  ;;  %3779 = vmatprep.mubr.bf16.mxu0 %v3121_v59  ;;  %v3963_v59 = vld [vmem:[%s4963_s4 + $0x38] sm:$0xff]  }
 0x80a   : > { %3765 = vmatprep.subr.bf16.mxu0 %v3957_v45 }
 0x80d   : > { %3766 = vmatpush3.bf16.msra.mxu0 %v3957_v45 }
 0x80e   : > { %3767 = vmatprep.subr.bf16.mxu0 %v3958_v30 }
 0x811   : > { %3768 = vmatpush3.bf16.msra.mxu0 %v3958_v30 }
 0x812   : > { %3769 = vmatprep.subr.bf16.mxu0 %v3959_v62 }
 0x815   : > { %3770 = vmatpush3.bf16.msra.mxu0 %v3959_v62 }
 0x816   : > { %3771 = vmatprep.subr.bf16.mxu0 %v3960_v61 }
 0x819   : > { %3772 = vmatpush3.bf16.msra.mxu0 %v3960_v61 }
 0x81a   : > { %3773 = vmatprep.subr.bf16.mxu0 %v3961_v49 }
 0x81d   : > { %3774 = vmatpush3.bf16.msra.mxu0 %v3961_v49 }
 0x81e   : > { %3775 = vmatprep.subr.bf16.mxu0 %v3962_v1 }
 0x821   : > { %3776 = vmatpush3.bf16.msra.mxu0 %v3962_v1 }
 0x822   : > { %3777 = vmatprep.subr.bf16.mxu0 %v3963_v59 }
 0x825   : > { %3778 = vmatpush3.bf16.msra.mxu0 %v3963_v59 }
 0x828   : > { %3780 = vmatmul.mubr.bf16.vlgmr.msra.gmra.mrb[32].mxu0 %v3122_v29 }
 0x829   : > { %3783 = vmatprep.mubr.bf16.mxu0 %v3123_v32 }
 0x8db   : > { %v3028_v52 = vpop.f32.mrb[28].mxu0  ;;  %v3069_v43 = vpop.f32.mrb[60].mxu1 }
 0x8dc   : > { %v3076_v42 = vadd.f32 %v3028_v52, %v5004_v37  ;;  %v3078_v57 = vadd.f32 %v3069_v43, %v5005_v39  ;;  %v3030_v54 = vpop.f32.mrb[29].mxu0  ;;  %v3071_v63 = vpop.f32.mrb[61].mxu1 }
 0x8dd   : > { %v3077_v50 = vadd.f32 %v3030_v54, %v5006_v35  ;;  %v3079_v6 = vadd.f32 %v3071_v63, %v4539_v40  ;;  %v3032_v7 = vpop.f32.mrb[30].mxu0  ;;  %v3073_v10 = vpop.f32.mrb[62].mxu1 }
 0x8de   : > { %v3737_v38 = vmul.f32 -1.442695, %v3076_v42  ;;  %v3033_v36 = vpop.f32.mrb[31].mxu0  ;;  %v3074_v29 = vpop.f32.mrb[63].mxu1  ;;  %v3739_v41 = vmul.f32 -1.442695, %v3078_v57 }
 0x8df   : > { %v3738_v12 = vmul.f32 -1.442695, %v3077_v50 }
 0x8e0   : > { %4088 = vpow2.f32 %v3737_v38 }
 0x8e1   : > { %4090 = vpow2.f32 %v3738_v12 }
 0x8e2   : > { %4092 = vtanh.f32 %v3079_v6 }
 0x8e3   : > { %4094 = vpow2.f32 %v3739_v41 }
 0x8ea   : > { %v4089_v33 = vpop.eup %4088 }
 0x8eb   : > { %v3089_v32 = vadd.f32 1.0, %v4089_v33  ;;  %v4091_v56 = vpop.eup %4090 }
 0x8ec   : > { %v3090_v28 = vadd.f32 1.0, %v4091_v56  ;;  %v4093_v58 = vpop.eup %4092 }
 0x8ed   : > { %4096 = vrcp.f32 %v3089_v32  ;;  %v4095_v3 = vpop.eup %4094 }
 0x8ee   : > { %4098 = vrcp.f32 %v3090_v28  ;;  %v3091_v8 = vadd.f32 1.0, %v4095_v3 }
 0x8f0   : > { %4100 = vrcp.f32 %v3091_v8 }
 0x8f7   : > { %v4097_v40 = vpop.eup %4096 }
 0x8f8   : > { %v3100_v4 = vmul.f32 %v4097_v40, %v4093_v58  ;;  %v4099_v5 = vpop.eup %4098 }
 0x8f9   : > { %v3099_v11 = vmul.f32 %v4099_v5, %v4875_v25 }
 0x8fa   : > { %v4101_v47 = vpop.eup %4100 }
 0x8fb   : > { %v3781_v13 = vpop.f32.mrb[32].mxu0  ;;  %v3101_v14 = vadd.f32 %v3100_v4, %v3099_v11 }
 0x8fc   : > { %v3239_v15 = vadd.f32 %v3781_v13, %v3740_v9  ;;  %v3230_v17 = vpop.f32.mrb[33].mxu0 }
 0x8fd   : > { %v3782_v18 = vpop.f32.mrb[34].mxu0  ;;  %4102 = vtanh.f32 %v3101_v14  ;;  %v3231_v24 = vadd.f32 %v3740_v9, %v3230_v17 }
 0x8fe   : > { %3265 = vmax.xlane.f32.xlu0 %v3239_v15  ;;  %v3233_v20 = vpop.f32.mrb[35].mxu0  ;;  %v3242_v19 = vadd.f32 %v3782_v18, %v3740_v9  ;;  %4104 = vtanh.f32 %v4878_v53 }
 0x8ff   : > { %v3234_v22 = vadd.f32 %v3740_v9, %v3233_v20 }
 0x901   : > { %3263 = vmax.xlane.f32.xlu1 %v3234_v22 }
 0x902   : > { %3261 = vmax.xlane.f32.xlu0 %v3231_v24 }
 0x906   : > { %3267 = vmax.xlane.f32.xlu0 %v3242_v19 }
 0x907   : > { %v4103_v46 = vpop.eup %4102 }
 0x908   : > { %v3103_v60 = vmul.f32 %v4103_v46, %v4101_v47  ;;  %v4105_v34 = vpop.eup %4104 }
 0x90a   : > { %4106 = vtanh.f32 %v3103_v60 }
 0x914   : > { %v4107_v48 = vpop.eup %4106 }
 0x915   : > { %v3124_v44 = vpack.c.bf16 %v4107_v48, %v4105_v34 }
 0x917   : > { %3784 = vmatmul.mubr.bf16.gmra.mrb[36].mxu0 %v3124_v44 }
 0x98b   : > { %v3266_v51 = vpop.xlane.xlu0 %3265 }
 0x98c   : > { %v4925_v23 = vsub.f32 %v3239_v15, %v3266_v51 }
 0x98e   : > { %v3264_v2 = vpop.xlane.xlu1 %3263  ;;  %v3289_v55 = vmul.f32 1.442695, %v4925_v23 }
 0x98f   : > { %v3262_v0 = vpop.xlane.xlu0 %3261  ;;  %v4923_v16 = vsub.f32 %v3234_v22, %v3264_v2 }
 0x990   : > { %v4921_v27 = vsub.f32 %v3231_v24, %v3262_v0 }
 0x991   : > { %v3287_v26 = vmul.f32 1.442695, %v4923_v16 }
 0x992   : > { %v3285_v25 = vmul.f32 1.442695, %v4921_v27 }
 0x993   : > { %v3268_v21 = vpop.xlane.xlu0 %3267 }
 0x994   : > { %v4929_v31 = vsub.f32 %v3242_v19, %v3268_v21  ;;  %4108 = vpow2.f32 %v3285_v25 }
 0x995   : > { %4110 = vpow2.f32 %v3287_v26 }
 0x996   : > { %v3291_v61 = vmul.f32 1.442695, %v4929_v31  ;;  %4112 = vpow2.f32 %v3289_v55 }
 0x998   : > { %4114 = vpow2.f32 %v3291_v61 }
 0x99e   : > { %v4109_v43 = vpop.eup %4108 }
 0x99f   : > { %v4111_v37 = vpop.eup %4110 }
 0x9a0   : > { %v4113_v42 = vpop.eup %4112 }
 0x9a2   : > { %v4115_v39 = vpop.eup %4114 }
 0x9ea   : > { %v3785_v53 = vpop.f32.mrb[36].mxu0 }
 0x9eb   : > { %v3246_v45 = vpop.f32.mrb[37].mxu0  ;;  %v3255_v59 = vadd.f32 %v3785_v53, %v3740_v9 }
 0x9ec   : > { %v3247_v30 = vadd.f32 %v3740_v9, %v3246_v45  ;;  %v3786_v62 = vpop.f32.mrb[38].mxu0 }
 0x9ed   : > { %v3249_v49 = vpop.f32.mrb[39].mxu0  ;;  %v3258_v52 = vadd.f32 %v3786_v62, %v3740_v9 }
 0x9ee   : > { %v3250_v1 = vadd.f32 %v3740_v9, %v3249_v49  ;;  %3269 = vmax.xlane.f32.xlu1 %v3247_v30 }
 0x9f0   : > { %3271 = vmax.xlane.f32.xlu0 %v3250_v1 }
 0x9f2   : > { %3273 = vmax.xlane.f32.xlu1 %v3255_v59 }
 0x9f4   : > { %3275 = vmax.xlane.f32.xlu0 %v3258_v52 }
 0x9f6   : > { %3301 = vadd.xlane.f32.xlu1 %v4109_v43 }
 0x9f8   : > { %3303 = vadd.xlane.f32.xlu0 %v4111_v37 }
 0x9fa   : > { %3305 = vadd.xlane.f32.xlu1 %v4113_v42 }
 0x9fc   : > { %3307 = vadd.xlane.f32.xlu0 %v4115_v39 }
 0xa7b   : > { %v3270_v57 = vpop.xlane.xlu1 %3269 }
 0xa7c   : > { %v3281_v54 = vsub.f32 %v3247_v30, %v3270_v57 }
 0xa7d   : > { %v3272_v63 = vpop.xlane.xlu0 %3271 }
 0xa7e   : > { %v3293_v35 = vmul.f32 1.442695, %v3281_v54  ;;  %v4933_v50 = vsub.f32 %v3250_v1, %v3272_v63 }
 0xa7f   : > { %v3274_v6 = vpop.xlane.xlu1 %3273 }
 0xa80   : > { %4116 = vpow2.f32 %v3293_v35  ;;  %v3295_v7 = vmul.f32 1.442695, %v4933_v50  ;;  %v3283_v10 = vsub.f32 %v3255_v59, %v3274_v6 }
 0xa81   : > { %v3276_v38 = vpop.xlane.xlu0 %3275 }
 0xa82   : > { %4118 = vpow2.f32 %v3295_v7  ;;  %v3297_v36 = vmul.f32 1.442695, %v3283_v10  ;;  %v3284_v29 = vsub.f32 %v3258_v52, %v3276_v38 }
 0xa83   : > { %v3302_v12 = vpop.xlane.xlu1 %3301 }
 0xa84   : > { %4120 = vpow2.f32 %v3297_v36  ;;  %v3299_v41 = vmul.f32 1.442695, %v3284_v29 }
 0xa85   : > { %4122 = vlog2.f32 %v3302_v12  ;;  %v3304_v33 = vpop.xlane.xlu0 %3303 }
 0xa86   : > { %4124 = vpow2.f32 %v3299_v41 }
 0xa87   : > { %4126 = vlog2.f32 %v3304_v33  ;;  %v3306_v32 = vpop.xlane.xlu1 %3305 }
 0xa88   : > { %4128 = vlog2.f32 %v3306_v32 }
 0xa89   : > { %v3308_v56 = vpop.xlane.xlu0 %3307 }
 0xa8a   : > { %v4117_v28 = vpop.eup %4116  ;;  %4130 = vlog2.f32 %v3308_v56 }
 0xa8b   : > { %3309 = vadd.xlane.f32.xlu1 %v4117_v28 }
 0xa8c   : > { %v4119_v58 = vpop.eup %4118 }
 0xa8d   : > { %3311 = vadd.xlane.f32.xlu0 %v4119_v58 }
 0xa8e   : > { %v4121_v3 = vpop.eup %4120 }
 0xa8f   : > { %v4123_v40 = vpop.eup %4122  ;;  %3313 = vadd.xlane.f32.xlu1 %v4121_v3 }
 0xa90   : > { %v4125_v4 = vpop.eup %4124  ;;  %v3318_v5 = vmul.f32 0.6931472, %v4123_v40 }
 0xa91   : > { %v4127_v8 = vpop.eup %4126  ;;  %3315 = vadd.xlane.f32.xlu0 %v4125_v4 }
 0xa92   : > { %v4129_v9 = vpop.eup %4128  ;;  %v3333_v11 = vsub.f32 %v4921_v27, %v3318_v5  ;;  %v3320_v13 = vmul.f32 0.6931472, %v4127_v8 }
 0xa93   : > { %v3322_v14 = vmul.f32 0.6931472, %v4129_v9 }
 0xa94   : > { %v4131_v15 = vpop.eup %4130  ;;  %3341 = vst [vmem:[%s4941_s10] sm:$0xff] %v3333_v11  ;;  %v3334_v17 = vsub.f32 %v4923_v16, %v3320_v13 }
 0xa95   : > { %v3335_v18 = vsub.f32 %v4925_v23, %v3322_v14  ;;  %v3324_v20 = vmul.f32 0.6931472, %v4131_v15 }
 0xa96   : > { %3342 = vst [vmem:[%s4941_s10 + $0x8] sm:$0xff] %v3334_v17 }
 0xa97   : > { %3343 = vst [vmem:[%s4941_s10 + $0x10] sm:$0xff] %v3335_v18  ;;  %v3336_v22 = vsub.f32 %v4929_v31, %v3324_v20 }
 0xa99   : > { %3344 = vst [vmem:[%s4941_s10 + $0x18] sm:$0xff] %v3336_v22 }
 0xb18   : > { %v3310_v24 = vpop.xlane.xlu1 %3309 }
 0xb19   : > { %4132 = vlog2.f32 %v3310_v24 }
 0xb1a   : > { %v3312_v19 = vpop.xlane.xlu0 %3311 }
 0xb1b   : > { %4134 = vlog2.f32 %v3312_v19 }
 0xb1c   : > { %v3314_v47 = vpop.xlane.xlu1 %3313 }
 0xb1d   : > { %4136 = vlog2.f32 %v3314_v47 }
 0xb1e   : > { %v3316_v46 = vpop.xlane.xlu0 %3315 }
 0xb1f   : > { %4138 = vlog2.f32 %v3316_v46 }
 0xb23   : > { %v4133_v60 = vpop.eup %4132 }
 0xb24   : > { %v3326_v34 = vmul.f32 0.6931472, %v4133_v60 }
 0xb25   : > { %v4135_v48 = vpop.eup %4134 }
 0xb26   : > { %v3337_v44 = vsub.f32 %v3281_v54, %v3326_v34  ;;  %v3328_v51 = vmul.f32 0.6931472, %v4135_v48 }
 0xb27   : > { %v4137_v0 = vpop.eup %4136 }
 0xb28   : > { %3345 = vst [vmem:[%s4941_s10 + $0x20] sm:$0xff] %v3337_v44  ;;  %v3338_v2 = vsub.f32 %v4933_v50, %v3328_v51  ;;  %v3330_v27 = vmul.f32 0.6931472, %v4137_v0 }
 0xb29   : > { %v4139_v16 = vpop.eup %4138 }
 0xb2a   : > { %3346 = vst [vmem:[%s4941_s10 + $0x28] sm:$0xff] %v3338_v2  ;;  %v3339_v21 = vsub.f32 %v3283_v10, %v3330_v27  ;;  %v3332_v23 = vmul.f32 0.6931472, %v4139_v16 }
 0xb2c   : > { %3347 = vst [vmem:[%s4941_s10 + $0x30] sm:$0xff] %v3339_v21  ;;  %v3340_v25 = vsub.f32 %v3284_v29, %v3332_v23 }
 0xb2e   : > { %3348 = vst [vmem:[%s4941_s10 + $0x38] sm:$0xff] %v3340_v25 }
 0xb2f PF: > { %s17_s21 = sadd.s32 1, %s4178_s21  }
 0xb30   : > { %p14_p3 = scmp.ge.s32.totalorder %s17_s21, 4  }
 0xb32   :  { %16 = sbr.rel (!%p14_p3) target bundleno = 1 (0x1), region = 79 }
 0xb39   :  { %3371 = vsyncpa [#allocation5], 1 }
 0xb3a   :  { %3373 = vsyncpa [#allocation5 + $0x1], 1 }

</bundles_post_ra>
